<compile_context>
chip_gen: v6e
topology: v6e:2x2x1
jax: 0.10.0
libtpu: 0.0.40
codegen_flags: <defaults>
</compile_context>

<pallas_src>
import functools

import jax
import jax.numpy as jnp
from jax.experimental import pallas as pl
from jax.experimental.pallas import tpu as pltpu


def _mha_kernel(heads, d, scaling,
                q_ref, k_ref, v_ref, mask_ref,
                wq_ref, bq_ref, wk_ref, bk_ref, wv_ref, bv_ref,
                wo_ref, bo_ref,
                out_ref, scores_ref):
    """One batch tile per grid step; all heads handled inside the step."""
    B, qS, qD = q_ref.shape
    _, vS, vD = k_ref.shape
    f32, bf16 = jnp.float32, jnp.bfloat16

    # Fold the batch tile into the matmul M dimension (fills MXU rows).
    q2 = q_ref[...].reshape(B * qS, qD).astype(bf16)
    k2 = k_ref[...].reshape(B * vS, vD).astype(bf16)
    v2 = v_ref[...].reshape(B * vS, vD).astype(bf16)

    # Additive mask bias, computed once per grid step (replaces a per-head
    # compare+select with -inf; exp(-1e30 - m) underflows to exactly 0).
    bias = jnp.where(mask_ref[...] != 0.0, 0.0, -1e30).astype(f32)   # (B,qS,vS)

    out_acc = jnp.zeros((B * qS, qD), f32)
    score_tiles = []

    # heads is small & static -> unrolled. Per-head operands come from
    # leading-axis indices of head-major tensors (cheap views): no sub-128-lane
    # activation slices and no explicit transpose of K.
    for h in range(heads):
        qp = (jnp.dot(q2, wq_ref[h], preferred_element_type=f32)
              + bq_ref[h]) * scaling                                  # (B*qS,d)
        kp = jnp.dot(k2, wk_ref[h], preferred_element_type=f32) + bk_ref[h]
        vp = jnp.dot(v2, wv_ref[h], preferred_element_type=f32) + bv_ref[h]

        qh = qp.reshape(B, qS, d).astype(bf16)
        kh = kp.reshape(B, vS, d).astype(bf16)
        vh = vp.reshape(B, vS, d).astype(bf16)

        # q . k^T as a batched contraction over the last dims (no kh.T).
        s = jnp.einsum('bqd,bkd->bqk', qh, kh,
                       preferred_element_type=f32) + bias            # (B,qS,vS)

        # softmax over keys in f32; the divide goes to the EUP slot.
        m = jnp.max(s, axis=-1, keepdims=True)
        e = jnp.exp(s - m)
        p = e * pl.reciprocal(jnp.sum(e, axis=-1, keepdims=True), approx=True)
        # TODO(synk): attention dropout omitted (inference semantics; identity
        # when the PyTorch module is not in training mode).
        score_tiles.append(p)

        av = jnp.einsum('bqk,bkd->bqd', p.astype(bf16), vh,
                        preferred_element_type=f32)                  # (B,qS,d)
        # Head-compose projection accumulated per head (Wo is head-major):
        # no VMEM scratch, no narrow lane-offset stores.
        out_acc = out_acc + jnp.dot(av.reshape(B * qS, d).astype(bf16),
                                    wo_ref[h], preferred_element_type=f32)

    # Single writeback of all heads' scores per grid step.
    scores_ref[...] = jnp.stack(score_tiles, axis=1)                 # (B,H,qS,vS)
    out_ref[...] = (out_acc + bo_ref[...]).reshape(B, qS, qD)


def multiheaded_attention(Q, K, V, attention_mask, params, *,
                          heads, head_dim, batch_tile=None):
    N, qS, qD = Q.shape
    _, vS, vD = K.shape
    scaling = float(head_dim) ** -0.5

    if batch_tile is None:
        # Fold enough batch elements per step so the projection matmuls see
        # ~128 rows (or the whole batch if it is smaller). Must divide N.
        # NOTE(v7x): at production batch sizes prefer a batch_tile that leaves
        # the grid with >=2 parallel steps so both TensorCores get work.
        target = max(1, pl.cdiv(128, qS))
        batch_tile = 1
        for cand in range(1, N + 1):
            if N % cand == 0 and cand <= target:
                batch_tile = cand
    assert N % batch_tile == 0
    grid = (N // batch_tile,)

    # Head-major, bf16 weights: heads are indexed on a leading axis in-kernel
    # and the MXU gets bf16 operands (f32 accumulation). Biases stay f32.
    bf16 = jnp.bfloat16
    wq3 = params["wq"].reshape(qD, heads, head_dim).transpose(1, 0, 2).astype(bf16)
    wk3 = params["wk"].reshape(vD, heads, head_dim).transpose(1, 0, 2).astype(bf16)
    wv3 = params["wv"].reshape(vD, heads, head_dim).transpose(1, 0, 2).astype(bf16)
    wo3 = params["wo"].reshape(heads, head_dim, qD).astype(bf16)
    bq3 = params["bq"].reshape(heads, 1, head_dim)
    bk3 = params["bk"].reshape(heads, 1, head_dim)
    bv3 = params["bv"].reshape(heads, 1, head_dim)
    bo = params["bo"]

    kernel = functools.partial(_mha_kernel, heads, head_dim, scaling)

    def w_spec(shape):
        return pl.BlockSpec(shape, lambda b, _n=len(shape): (0,) * _n)

    grid_spec = pltpu.PrefetchScalarGridSpec(
        num_scalar_prefetch=0,
        grid=grid,
        in_specs=[
            pl.BlockSpec((batch_tile, qS, qD), lambda b: (b, 0, 0)),   # Q
            pl.BlockSpec((batch_tile, vS, vD), lambda b: (b, 0, 0)),   # K
            pl.BlockSpec((batch_tile, vS, vD), lambda b: (b, 0, 0)),   # V
            pl.BlockSpec((batch_tile, qS, vS), lambda b: (b, 0, 0)),   # mask
            w_spec((heads, qD, head_dim)),                             # Wq
            w_spec((heads, 1, head_dim)),                              # bq
            w_spec((heads, vD, head_dim)),                             # Wk
            w_spec((heads, 1, head_dim)),                              # bk
            w_spec((heads, vD, head_dim)),                             # Wv
            w_spec((heads, 1, head_dim)),                              # bv
            w_spec((heads, head_dim, qD)),                             # Wo
            w_spec((1, qD)),                                           # bo
        ],
        out_specs=(
            pl.BlockSpec((batch_tile, qS, qD), lambda b: (b, 0, 0)),
            # NOTE: at production shapes keep vS a multiple of 128 so this
            # scores writeback is lane-dense (unmasked vst); tile qS (and use
            # vmem_limit_bytes) when scores/mask blocks outgrow v7x's 64 MiB.
            pl.BlockSpec((batch_tile, heads, qS, vS), lambda b: (b, 0, 0, 0)),
        ),
    )

    out_shapes = (
        jax.ShapeDtypeStruct((N, qS, qD), jnp.float32),
        jax.ShapeDtypeStruct((N, heads, qS, vS), jnp.float32),
    )

    attended, scores = pl.pallas_call(
        kernel,
        out_shape=out_shapes,
        grid_spec=grid_spec,
        compiler_params=pltpu.CompilerParams(dimension_semantics=("parallel",)),
    )(Q, K, V, attention_mask,
      wq3, bq3, wk3, bk3, wv3, bv3, wo3, bo)
    return {"attended_values": attended, "attention_scores": scores}


def _reference(Q, K, V, mask, params, heads, d):
    """Pure-JAX replica of the PyTorch forward. It mirrors the kernel's bf16
    MXU-operand casts (with f32 accumulation) so the comparison verifies the
    kernel implementation; remaining deltas (approx reciprocal, accumulation
    order) are covered by the tolerance below."""
    N, qS, _ = Q.shape
    vS = K.shape[1]
    bf16, f32 = jnp.bfloat16, jnp.float32
    scaling = float(d) ** -0.5

    def mm(a, b):
        return jnp.dot(a.astype(bf16), b.astype(bf16), preferred_element_type=f32)

    Qp = (mm(Q.reshape(N * qS, -1), params["wq"]) + params["bq"][0]) * scaling
    Kp = mm(K.reshape(N * vS, -1), params["wk"]) + params["bk"][0]
    Vp = mm(V.reshape(N * vS, -1), params["wv"]) + params["bv"][0]
    Qh = Qp.reshape(N, qS, heads, d).astype(bf16)
    Kh = Kp.reshape(N, vS, heads, d).astype(bf16)
    Vh = Vp.reshape(N, vS, heads, d).astype(bf16)
    w = jnp.einsum("bqnh,bknh->bqkn", Qh, Kh, preferred_element_type=f32)
    w = jnp.where(mask[..., None] != 0, w, -jnp.inf)
    p = jax.nn.softmax(w, axis=-2)
    av = jnp.einsum("bqkn,bknh->bqnh", p.astype(bf16), Vh,
                    preferred_element_type=f32).reshape(N, qS, heads * d)
    out = mm(av, params["wo"]) + params["bo"][0]
    return out, jnp.transpose(p, (0, 3, 1, 2))


def _xavier(key, shape):
    fan_in, fan_out = shape
    bound = (6.0 / (fan_in + fan_out)) ** 0.5
    return jax.random.uniform(key, shape, jnp.float32, -bound, bound)


if __name__ == "__main__":
    # config: heads=4, head_dim=8, query_dim=value_dim=32, relative_pos_enc=False
    N, qS, vS = 2, 8, 8
    qD = vD = 32
    heads, d = 4, 8
    Hd = heads * d

    key = jax.random.PRNGKey(0)
    ks = jax.random.split(key, 12)

    params = {
        "wq": _xavier(ks[0], (qD, Hd)),
        "bq": jax.random.uniform(ks[1], (1, Hd), jnp.float32, -0.1, 0.1),
        "wk": _xavier(ks[2], (vD, Hd)),
        "bk": jax.random.uniform(ks[3], (1, Hd), jnp.float32, -0.1, 0.1),
        "wv": _xavier(ks[4], (vD, Hd)),
        "bv": jax.random.uniform(ks[5], (1, Hd), jnp.float32, -0.1, 0.1),
        "wo": _xavier(ks[6], (Hd, qD)),
        "bo": jax.random.uniform(ks[7], (1, qD), jnp.float32, -0.1, 0.1),
    }

    Q = jax.random.normal(ks[8], (N, qS, qD), jnp.float32)
    K = jax.random.normal(ks[9], (N, vS, vD), jnp.float32)
    V = jax.random.normal(ks[10], (N, vS, vD), jnp.float32)

    # Attention mask (1 = attend, 0 = masked). Every query keeps >=1 valid key.
    mask = jnp.ones((N, qS, vS), jnp.float32)
    mask = mask.at[1, :, vS - 2:].set(0.0)

    out = multiheaded_attention(Q, K, V, mask, params, heads=heads, head_dim=d)
    jax.block_until_ready(out)

    ref_vals, ref_scores = _reference(Q, K, V, mask, params, heads, d)

    assert out["attended_values"].shape == (N, qS, qD)
    assert out["attention_scores"].shape == (N, heads, qS, vS)
    # Tolerance accounts for the approximate EUP reciprocal in the kernel's
    # softmax and for differing f32 accumulation orders.
    assert jnp.allclose(out["attended_values"], ref_vals, atol=1e-2, rtol=1e-2)
    assert jnp.allclose(out["attention_scores"], ref_scores, atol=1e-2, rtol=1e-2)

    print("KERNEL_OK")
</pallas_src>

<mosaic_0001>
module attributes {stable_mosaic.version = 11 : i64} {
  func.func @_mha_kernel(%arg0: i32, %arg1: memref<2x8x32xf32, #tpu.memory_space<vmem>>, %arg2: memref<2x8x32xf32, #tpu.memory_space<vmem>>, %arg3: memref<2x8x32xf32, #tpu.memory_space<vmem>>, %arg4: memref<2x8x8xf32, #tpu.memory_space<vmem>>, %arg5: memref<4x32x8xbf16, #tpu.memory_space<vmem>>, %arg6: memref<4x1x8xf32, #tpu.memory_space<vmem>>, %arg7: memref<4x32x8xbf16, #tpu.memory_space<vmem>>, %arg8: memref<4x1x8xf32, #tpu.memory_space<vmem>>, %arg9: memref<4x32x8xbf16, #tpu.memory_space<vmem>>, %arg10: memref<4x1x8xf32, #tpu.memory_space<vmem>>, %arg11: memref<4x8x32xbf16, #tpu.memory_space<vmem>>, %arg12: memref<1x32xf32, #tpu.memory_space<vmem>>, %arg13: memref<2x8x32xf32, #tpu.memory_space<vmem>>, %arg14: memref<2x4x8x8xf32, #tpu.memory_space<vmem>>) attributes {dimension_semantics = [#tpu.dimension_semantics<parallel>], iteration_bounds = array<i64: 1>, scalar_prefetch = 0 : i64, scratch_operands = 0 : i64, tpu.core_type = #tpu.core_type<tc>, window_params = [{transform_indices = @transform_0, window_bounds = array<i64: 2, 8, 32>}, {transform_indices = @transform_1, window_bounds = array<i64: 2, 8, 32>}, {transform_indices = @transform_2, window_bounds = array<i64: 2, 8, 32>}, {transform_indices = @transform_3, window_bounds = array<i64: 2, 8, 8>}, {pipeline_mode = #tpu.pipeline_mode<synchronous>, transform_indices = @transform_4, window_bounds = array<i64: 4, 32, 8>}, {pipeline_mode = #tpu.pipeline_mode<synchronous>, transform_indices = @transform_5, window_bounds = array<i64: 4, 1, 8>}, {pipeline_mode = #tpu.pipeline_mode<synchronous>, transform_indices = @transform_6, window_bounds = array<i64: 4, 32, 8>}, {pipeline_mode = #tpu.pipeline_mode<synchronous>, transform_indices = @transform_7, window_bounds = array<i64: 4, 1, 8>}, {pipeline_mode = #tpu.pipeline_mode<synchronous>, transform_indices = @transform_8, window_bounds = array<i64: 4, 32, 8>}, {pipeline_mode = #tpu.pipeline_mode<synchronous>, transform_indices = @transform_9, window_bounds = array<i64: 4, 1, 8>}, {pipeline_mode = #tpu.pipeline_mode<synchronous>, transform_indices = @transform_10, window_bounds = array<i64: 4, 8, 32>}, {pipeline_mode = #tpu.pipeline_mode<synchronous>, transform_indices = @transform_11, window_bounds = array<i64: 1, 32>}, {transform_indices = @transform_12, window_bounds = array<i64: 2, 8, 32>}, {transform_indices = @transform_13, window_bounds = array<i64: 2, 4, 8, 8>}]} {
    %c0 = arith.constant 0 : index
    %c0_0 = arith.constant 0 : index
    %c0_1 = arith.constant 0 : index
    %0 = vector.load %arg1[%c0, %c0_0, %c0_1] : memref<2x8x32xf32, #tpu.memory_space<vmem>>, vector<2x8x32xf32>
    %1 = vector.shape_cast %0 : vector<2x8x32xf32> to vector<16x32xf32>
    %2 = arith.truncf %1 : vector<16x32xf32> to vector<16x32xbf16>
    %c0_2 = arith.constant 0 : index
    %c0_3 = arith.constant 0 : index
    %c0_4 = arith.constant 0 : index
    %3 = vector.load %arg2[%c0_2, %c0_3, %c0_4] : memref<2x8x32xf32, #tpu.memory_space<vmem>>, vector<2x8x32xf32>
    %4 = vector.shape_cast %3 : vector<2x8x32xf32> to vector<16x32xf32>
    %5 = arith.truncf %4 : vector<16x32xf32> to vector<16x32xbf16>
    %c0_5 = arith.constant 0 : index
    %c0_6 = arith.constant 0 : index
    %c0_7 = arith.constant 0 : index
    %6 = vector.load %arg3[%c0_5, %c0_6, %c0_7] : memref<2x8x32xf32, #tpu.memory_space<vmem>>, vector<2x8x32xf32>
    %7 = vector.shape_cast %6 : vector<2x8x32xf32> to vector<16x32xf32>
    %8 = arith.truncf %7 : vector<16x32xf32> to vector<16x32xbf16>
    %c0_8 = arith.constant 0 : index
    %c0_9 = arith.constant 0 : index
    %c0_10 = arith.constant 0 : index
    %9 = vector.load %arg4[%c0_8, %c0_9, %c0_10] : memref<2x8x8xf32, #tpu.memory_space<vmem>>, vector<2x8x8xf32>
    %cst = arith.constant 0.000000e+00 : f32
    %10 = vector.broadcast %cst : f32 to vector<2x8x8xf32>
    %11 = arith.cmpf one, %9, %10 : vector<2x8x8xf32>
    %cst_11 = arith.constant 0.000000e+00 : f32
    %cst_12 = arith.constant -1.000000e+30 : f32
    %12 = vector.broadcast %cst_11 : f32 to vector<2x8x8xf32>
    %13 = vector.broadcast %cst_12 : f32 to vector<2x8x8xf32>
    %14 = arith.select %11, %12, %13 : vector<2x8x8xi1>, vector<2x8x8xf32>
    %cst_13 = arith.constant 0.000000e+00 : f32
    %15 = vector.broadcast %cst_13 : f32 to vector<16x32xf32>
    %c0_14 = arith.constant 0 : index
    %c0_15 = arith.constant 0 : index
    %c0_16 = arith.constant 0 : index
    %16 = vector.load %arg5[%c0_14, %c0_15, %c0_16] : memref<4x32x8xbf16, #tpu.memory_space<vmem>>, vector<1x32x8xbf16>
    %17 = vector.shape_cast %16 : vector<1x32x8xbf16> to vector<32x8xbf16>
    %cst_17 = arith.constant dense<0.000000e+00> : vector<16x8xf32>
    %18 = tpu.matmul %2, %17, %cst_17 {dimension_numbers = #tpu.dot_dimension_numbers<[1], [0], [0], [1], [0, 0, 1, 1], [], []>} : vector<16x32xbf16>, vector<32x8xbf16>, vector<16x8xf32> -> vector<16x8xf32>
    %c0_18 = arith.constant 0 : index
    %c0_19 = arith.constant 0 : index
    %c0_20 = arith.constant 0 : index
    %19 = vector.load %arg6[%c0_18, %c0_19, %c0_20] : memref<4x1x8xf32, #tpu.memory_space<vmem>>, vector<1x1x8xf32>
    %20 = vector.shape_cast %19 : vector<1x1x8xf32> to vector<1x8xf32>
    %21 = vector.broadcast %20 : vector<1x8xf32> to vector<16x8xf32>
    %22 = arith.addf %18, %21 : vector<16x8xf32>
    %cst_21 = arith.constant 0.353553385 : f32
    %23 = vector.broadcast %cst_21 : f32 to vector<16x8xf32>
    %24 = arith.mulf %22, %23 : vector<16x8xf32>
    %c0_22 = arith.constant 0 : index
    %c0_23 = arith.constant 0 : index
    %c0_24 = arith.constant 0 : index
    %25 = vector.load %arg7[%c0_22, %c0_23, %c0_24] : memref<4x32x8xbf16, #tpu.memory_space<vmem>>, vector<1x32x8xbf16>
    %26 = vector.shape_cast %25 : vector<1x32x8xbf16> to vector<32x8xbf16>
    %cst_25 = arith.constant dense<0.000000e+00> : vector<16x8xf32>
    %27 = tpu.matmul %5, %26, %cst_25 {dimension_numbers = #tpu.dot_dimension_numbers<[1], [0], [0], [1], [0, 0, 1, 1], [], []>} : vector<16x32xbf16>, vector<32x8xbf16>, vector<16x8xf32> -> vector<16x8xf32>
    %c0_26 = arith.constant 0 : index
    %c0_27 = arith.constant 0 : index
    %c0_28 = arith.constant 0 : index
    %28 = vector.load %arg8[%c0_26, %c0_27, %c0_28] : memref<4x1x8xf32, #tpu.memory_space<vmem>>, vector<1x1x8xf32>
    %29 = vector.shape_cast %28 : vector<1x1x8xf32> to vector<1x8xf32>
    %30 = vector.broadcast %29 : vector<1x8xf32> to vector<16x8xf32>
    %31 = arith.addf %27, %30 : vector<16x8xf32>
    %c0_29 = arith.constant 0 : index
    %c0_30 = arith.constant 0 : index
    %c0_31 = arith.constant 0 : index
    %32 = vector.load %arg9[%c0_29, %c0_30, %c0_31] : memref<4x32x8xbf16, #tpu.memory_space<vmem>>, vector<1x32x8xbf16>
    %33 = vector.shape_cast %32 : vector<1x32x8xbf16> to vector<32x8xbf16>
    %cst_32 = arith.constant dense<0.000000e+00> : vector<16x8xf32>
    %34 = tpu.matmul %8, %33, %cst_32 {dimension_numbers = #tpu.dot_dimension_numbers<[1], [0], [0], [1], [0, 0, 1, 1], [], []>} : vector<16x32xbf16>, vector<32x8xbf16>, vector<16x8xf32> -> vector<16x8xf32>
    %c0_33 = arith.constant 0 : index
    %c0_34 = arith.constant 0 : index
    %c0_35 = arith.constant 0 : index
    %35 = vector.load %arg10[%c0_33, %c0_34, %c0_35] : memref<4x1x8xf32, #tpu.memory_space<vmem>>, vector<1x1x8xf32>
    %36 = vector.shape_cast %35 : vector<1x1x8xf32> to vector<1x8xf32>
    %37 = vector.broadcast %36 : vector<1x8xf32> to vector<16x8xf32>
    %38 = arith.addf %34, %37 : vector<16x8xf32>
    %39 = vector.shape_cast %24 : vector<16x8xf32> to vector<2x8x8xf32>
    %40 = arith.truncf %39 : vector<2x8x8xf32> to vector<2x8x8xbf16>
    %41 = vector.shape_cast %31 : vector<16x8xf32> to vector<2x8x8xf32>
    %42 = arith.truncf %41 : vector<2x8x8xf32> to vector<2x8x8xbf16>
    %43 = vector.shape_cast %38 : vector<16x8xf32> to vector<2x8x8xf32>
    %44 = arith.truncf %43 : vector<2x8x8xf32> to vector<2x8x8xbf16>
    "tpu.trace_start"() <{level = 10 : i32, message = "bqd,bkd->bqk"}> : () -> ()
    %cst_36 = arith.constant dense<0.000000e+00> : vector<2x8x8xf32>
    %45 = tpu.matmul %40, %42, %cst_36 {dimension_numbers = #tpu.dot_dimension_numbers<[2], [2], [1], [1], [0, 0, 0, 1, 1, 1], [0], [0]>} : vector<2x8x8xbf16>, vector<2x8x8xbf16>, vector<2x8x8xf32> -> vector<2x8x8xf32>
    "tpu.trace_stop"() : () -> ()
    %46 = arith.addf %45, %14 : vector<2x8x8xf32>
    %cst_37 = arith.constant dense<0xFF800000> : vector<2x8xf32>
    %47 = vector.multi_reduction <maximumf>, %46, %cst_37 [2] : vector<2x8x8xf32> to vector<2x8xf32>
    %48 = vector.shape_cast %47 : vector<2x8xf32> to vector<2x8x1xf32>
    %49 = vector.broadcast %48 : vector<2x8x1xf32> to vector<2x8x8xf32>
    %50 = arith.subf %46, %49 : vector<2x8x8xf32>
    %51 = math.exp %50 : vector<2x8x8xf32>
    %cst_38 = arith.constant dense<0.000000e+00> : vector<2x8xf32>
    %52 = vector.multi_reduction <add>, %51, %cst_38 [2] : vector<2x8x8xf32> to vector<2x8xf32>
    %53 = vector.shape_cast %52 : vector<2x8xf32> to vector<2x8x1xf32>
    %54 = tpu.reciprocal %53 {approx = true} : vector<2x8x1xf32> -> vector<2x8x1xf32>
    %55 = vector.broadcast %54 : vector<2x8x1xf32> to vector<2x8x8xf32>
    %56 = arith.mulf %51, %55 : vector<2x8x8xf32>
    %57 = arith.truncf %56 : vector<2x8x8xf32> to vector<2x8x8xbf16>
    "tpu.trace_start"() <{level = 10 : i32, message = "bqk,bkd->bqd"}> : () -> ()
    %cst_39 = arith.constant dense<0.000000e+00> : vector<2x8x8xf32>
    %58 = tpu.matmul %57, %44, %cst_39 {dimension_numbers = #tpu.dot_dimension_numbers<[2], [1], [1], [2], [0, 0, 0, 1, 1, 2], [0], [0]>} : vector<2x8x8xbf16>, vector<2x8x8xbf16>, vector<2x8x8xf32> -> vector<2x8x8xf32>
    "tpu.trace_stop"() : () -> ()
    %59 = vector.shape_cast %58 : vector<2x8x8xf32> to vector<16x8xf32>
    %60 = arith.truncf %59 : vector<16x8xf32> to vector<16x8xbf16>
    %c0_40 = arith.constant 0 : index
    %c0_41 = arith.constant 0 : index
    %c0_42 = arith.constant 0 : index
    %61 = vector.load %arg11[%c0_40, %c0_41, %c0_42] : memref<4x8x32xbf16, #tpu.memory_space<vmem>>, vector<1x8x32xbf16>
    %62 = vector.shape_cast %61 : vector<1x8x32xbf16> to vector<8x32xbf16>
    %cst_43 = arith.constant dense<0.000000e+00> : vector<16x32xf32>
    %63 = tpu.matmul %60, %62, %cst_43 {dimension_numbers = #tpu.dot_dimension_numbers<[1], [0], [0], [1], [0, 0, 1, 1], [], []>} : vector<16x8xbf16>, vector<8x32xbf16>, vector<16x32xf32> -> vector<16x32xf32>
    %64 = arith.addf %15, %63 : vector<16x32xf32>
    %c1 = arith.constant 1 : index
    %c0_44 = arith.constant 0 : index
    %c0_45 = arith.constant 0 : index
    %65 = vector.load %arg5[%c1, %c0_44, %c0_45] : memref<4x32x8xbf16, #tpu.memory_space<vmem>>, vector<1x32x8xbf16>
    %66 = vector.shape_cast %65 : vector<1x32x8xbf16> to vector<32x8xbf16>
    %cst_46 = arith.constant dense<0.000000e+00> : vector<16x8xf32>
    %67 = tpu.matmul %2, %66, %cst_46 {dimension_numbers = #tpu.dot_dimension_numbers<[1], [0], [0], [1], [0, 0, 1, 1], [], []>} : vector<16x32xbf16>, vector<32x8xbf16>, vector<16x8xf32> -> vector<16x8xf32>
    %c1_47 = arith.constant 1 : index
    %c0_48 = arith.constant 0 : index
    %c0_49 = arith.constant 0 : index
    %68 = vector.load %arg6[%c1_47, %c0_48, %c0_49] : memref<4x1x8xf32, #tpu.memory_space<vmem>>, vector<1x1x8xf32>
    %69 = vector.shape_cast %68 : vector<1x1x8xf32> to vector<1x8xf32>
    %70 = vector.broadcast %69 : vector<1x8xf32> to vector<16x8xf32>
    %71 = arith.addf %67, %70 : vector<16x8xf32>
    %cst_50 = arith.constant 0.353553385 : f32
    %72 = vector.broadcast %cst_50 : f32 to vector<16x8xf32>
    %73 = arith.mulf %71, %72 : vector<16x8xf32>
    %c1_51 = arith.constant 1 : index
    %c0_52 = arith.constant 0 : index
    %c0_53 = arith.constant 0 : index
    %74 = vector.load %arg7[%c1_51, %c0_52, %c0_53] : memref<4x32x8xbf16, #tpu.memory_space<vmem>>, vector<1x32x8xbf16>
    %75 = vector.shape_cast %74 : vector<1x32x8xbf16> to vector<32x8xbf16>
    %cst_54 = arith.constant dense<0.000000e+00> : vector<16x8xf32>
    %76 = tpu.matmul %5, %75, %cst_54 {dimension_numbers = #tpu.dot_dimension_numbers<[1], [0], [0], [1], [0, 0, 1, 1], [], []>} : vector<16x32xbf16>, vector<32x8xbf16>, vector<16x8xf32> -> vector<16x8xf32>
    %c1_55 = arith.constant 1 : index
    %c0_56 = arith.constant 0 : index
    %c0_57 = arith.constant 0 : index
    %77 = vector.load %arg8[%c1_55, %c0_56, %c0_57] : memref<4x1x8xf32, #tpu.memory_space<vmem>>, vector<1x1x8xf32>
    %78 = vector.shape_cast %77 : vector<1x1x8xf32> to vector<1x8xf32>
    %79 = vector.broadcast %78 : vector<1x8xf32> to vector<16x8xf32>
    %80 = arith.addf %76, %79 : vector<16x8xf32>
    %c1_58 = arith.constant 1 : index
    %c0_59 = arith.constant 0 : index
    %c0_60 = arith.constant 0 : index
    %81 = vector.load %arg9[%c1_58, %c0_59, %c0_60] : memref<4x32x8xbf16, #tpu.memory_space<vmem>>, vector<1x32x8xbf16>
    %82 = vector.shape_cast %81 : vector<1x32x8xbf16> to vector<32x8xbf16>
    %cst_61 = arith.constant dense<0.000000e+00> : vector<16x8xf32>
    %83 = tpu.matmul %8, %82, %cst_61 {dimension_numbers = #tpu.dot_dimension_numbers<[1], [0], [0], [1], [0, 0, 1, 1], [], []>} : vector<16x32xbf16>, vector<32x8xbf16>, vector<16x8xf32> -> vector<16x8xf32>
    %c1_62 = arith.constant 1 : index
    %c0_63 = arith.constant 0 : index
    %c0_64 = arith.constant 0 : index
    %84 = vector.load %arg10[%c1_62, %c0_63, %c0_64] : memref<4x1x8xf32, #tpu.memory_space<vmem>>, vector<1x1x8xf32>
    %85 = vector.shape_cast %84 : vector<1x1x8xf32> to vector<1x8xf32>
    %86 = vector.broadcast %85 : vector<1x8xf32> to vector<16x8xf32>
    %87 = arith.addf %83, %86 : vector<16x8xf32>
    %88 = vector.shape_cast %73 : vector<16x8xf32> to vector<2x8x8xf32>
    %89 = arith.truncf %88 : vector<2x8x8xf32> to vector<2x8x8xbf16>
    %90 = vector.shape_cast %80 : vector<16x8xf32> to vector<2x8x8xf32>
    %91 = arith.truncf %90 : vector<2x8x8xf32> to vector<2x8x8xbf16>
    %92 = vector.shape_cast %87 : vector<16x8xf32> to vector<2x8x8xf32>
    %93 = arith.truncf %92 : vector<2x8x8xf32> to vector<2x8x8xbf16>
    "tpu.trace_start"() <{level = 10 : i32, message = "bqd,bkd->bqk"}> : () -> ()
    %cst_65 = arith.constant dense<0.000000e+00> : vector<2x8x8xf32>
    %94 = tpu.matmul %89, %91, %cst_65 {dimension_numbers = #tpu.dot_dimension_numbers<[2], [2], [1], [1], [0, 0, 0, 1, 1, 1], [0], [0]>} : vector<2x8x8xbf16>, vector<2x8x8xbf16>, vector<2x8x8xf32> -> vector<2x8x8xf32>
    "tpu.trace_stop"() : () -> ()
    %95 = arith.addf %94, %14 : vector<2x8x8xf32>
    %cst_66 = arith.constant dense<0xFF800000> : vector<2x8xf32>
    %96 = vector.multi_reduction <maximumf>, %95, %cst_66 [2] : vector<2x8x8xf32> to vector<2x8xf32>
    %97 = vector.shape_cast %96 : vector<2x8xf32> to vector<2x8x1xf32>
    %98 = vector.broadcast %97 : vector<2x8x1xf32> to vector<2x8x8xf32>
    %99 = arith.subf %95, %98 : vector<2x8x8xf32>
    %100 = math.exp %99 : vector<2x8x8xf32>
    %cst_67 = arith.constant dense<0.000000e+00> : vector<2x8xf32>
    %101 = vector.multi_reduction <add>, %100, %cst_67 [2] : vector<2x8x8xf32> to vector<2x8xf32>
    %102 = vector.shape_cast %101 : vector<2x8xf32> to vector<2x8x1xf32>
    %103 = tpu.reciprocal %102 {approx = true} : vector<2x8x1xf32> -> vector<2x8x1xf32>
    %104 = vector.broadcast %103 : vector<2x8x1xf32> to vector<2x8x8xf32>
    %105 = arith.mulf %100, %104 : vector<2x8x8xf32>
    %106 = arith.truncf %105 : vector<2x8x8xf32> to vector<2x8x8xbf16>
    "tpu.trace_start"() <{level = 10 : i32, message = "bqk,bkd->bqd"}> : () -> ()
    %cst_68 = arith.constant dense<0.000000e+00> : vector<2x8x8xf32>
    %107 = tpu.matmul %106, %93, %cst_68 {dimension_numbers = #tpu.dot_dimension_numbers<[2], [1], [1], [2], [0, 0, 0, 1, 1, 2], [0], [0]>} : vector<2x8x8xbf16>, vector<2x8x8xbf16>, vector<2x8x8xf32> -> vector<2x8x8xf32>
    "tpu.trace_stop"() : () -> ()
    %108 = vector.shape_cast %107 : vector<2x8x8xf32> to vector<16x8xf32>
    %109 = arith.truncf %108 : vector<16x8xf32> to vector<16x8xbf16>
    %c1_69 = arith.constant 1 : index
    %c0_70 = arith.constant 0 : index
    %c0_71 = arith.constant 0 : index
    %110 = vector.load %arg11[%c1_69, %c0_70, %c0_71] : memref<4x8x32xbf16, #tpu.memory_space<vmem>>, vector<1x8x32xbf16>
    %111 = vector.shape_cast %110 : vector<1x8x32xbf16> to vector<8x32xbf16>
    %cst_72 = arith.constant dense<0.000000e+00> : vector<16x32xf32>
    %112 = tpu.matmul %109, %111, %cst_72 {dimension_numbers = #tpu.dot_dimension_numbers<[1], [0], [0], [1], [0, 0, 1, 1], [], []>} : vector<16x8xbf16>, vector<8x32xbf16>, vector<16x32xf32> -> vector<16x32xf32>
    %113 = arith.addf %64, %112 : vector<16x32xf32>
    %c2 = arith.constant 2 : index
    %c0_73 = arith.constant 0 : index
    %c0_74 = arith.constant 0 : index
    %114 = vector.load %arg5[%c2, %c0_73, %c0_74] : memref<4x32x8xbf16, #tpu.memory_space<vmem>>, vector<1x32x8xbf16>
    %115 = vector.shape_cast %114 : vector<1x32x8xbf16> to vector<32x8xbf16>
    %cst_75 = arith.constant dense<0.000000e+00> : vector<16x8xf32>
    %116 = tpu.matmul %2, %115, %cst_75 {dimension_numbers = #tpu.dot_dimension_numbers<[1], [0], [0], [1], [0, 0, 1, 1], [], []>} : vector<16x32xbf16>, vector<32x8xbf16>, vector<16x8xf32> -> vector<16x8xf32>
    %c2_76 = arith.constant 2 : index
    %c0_77 = arith.constant 0 : index
    %c0_78 = arith.constant 0 : index
    %117 = vector.load %arg6[%c2_76, %c0_77, %c0_78] : memref<4x1x8xf32, #tpu.memory_space<vmem>>, vector<1x1x8xf32>
    %118 = vector.shape_cast %117 : vector<1x1x8xf32> to vector<1x8xf32>
    %119 = vector.broadcast %118 : vector<1x8xf32> to vector<16x8xf32>
    %120 = arith.addf %116, %119 : vector<16x8xf32>
    %cst_79 = arith.constant 0.353553385 : f32
    %121 = vector.broadcast %cst_79 : f32 to vector<16x8xf32>
    %122 = arith.mulf %120, %121 : vector<16x8xf32>
    %c2_80 = arith.constant 2 : index
    %c0_81 = arith.constant 0 : index
    %c0_82 = arith.constant 0 : index
    %123 = vector.load %arg7[%c2_80, %c0_81, %c0_82] : memref<4x32x8xbf16, #tpu.memory_space<vmem>>, vector<1x32x8xbf16>
    %124 = vector.shape_cast %123 : vector<1x32x8xbf16> to vector<32x8xbf16>
    %cst_83 = arith.constant dense<0.000000e+00> : vector<16x8xf32>
    %125 = tpu.matmul %5, %124, %cst_83 {dimension_numbers = #tpu.dot_dimension_numbers<[1], [0], [0], [1], [0, 0, 1, 1], [], []>} : vector<16x32xbf16>, vector<32x8xbf16>, vector<16x8xf32> -> vector<16x8xf32>
    %c2_84 = arith.constant 2 : index
    %c0_85 = arith.constant 0 : index
    %c0_86 = arith.constant 0 : index
    %126 = vector.load %arg8[%c2_84, %c0_85, %c0_86] : memref<4x1x8xf32, #tpu.memory_space<vmem>>, vector<1x1x8xf32>
    %127 = vector.shape_cast %126 : vector<1x1x8xf32> to vector<1x8xf32>
    %128 = vector.broadcast %127 : vector<1x8xf32> to vector<16x8xf32>
    %129 = arith.addf %125, %128 : vector<16x8xf32>
    %c2_87 = arith.constant 2 : index
    %c0_88 = arith.constant 0 : index
    %c0_89 = arith.constant 0 : index
    %130 = vector.load %arg9[%c2_87, %c0_88, %c0_89] : memref<4x32x8xbf16, #tpu.memory_space<vmem>>, vector<1x32x8xbf16>
    %131 = vector.shape_cast %130 : vector<1x32x8xbf16> to vector<32x8xbf16>
    %cst_90 = arith.constant dense<0.000000e+00> : vector<16x8xf32>
    %132 = tpu.matmul %8, %131, %cst_90 {dimension_numbers = #tpu.dot_dimension_numbers<[1], [0], [0], [1], [0, 0, 1, 1], [], []>} : vector<16x32xbf16>, vector<32x8xbf16>, vector<16x8xf32> -> vector<16x8xf32>
    %c2_91 = arith.constant 2 : index
    %c0_92 = arith.constant 0 : index
    %c0_93 = arith.constant 0 : index
    %133 = vector.load %arg10[%c2_91, %c0_92, %c0_93] : memref<4x1x8xf32, #tpu.memory_space<vmem>>, vector<1x1x8xf32>
    %134 = vector.shape_cast %133 : vector<1x1x8xf32> to vector<1x8xf32>
    %135 = vector.broadcast %134 : vector<1x8xf32> to vector<16x8xf32>
    %136 = arith.addf %132, %135 : vector<16x8xf32>
    %137 = vector.shape_cast %122 : vector<16x8xf32> to vector<2x8x8xf32>
    %138 = arith.truncf %137 : vector<2x8x8xf32> to vector<2x8x8xbf16>
    %139 = vector.shape_cast %129 : vector<16x8xf32> to vector<2x8x8xf32>
    %140 = arith.truncf %139 : vector<2x8x8xf32> to vector<2x8x8xbf16>
    %141 = vector.shape_cast %136 : vector<16x8xf32> to vector<2x8x8xf32>
    %142 = arith.truncf %141 : vector<2x8x8xf32> to vector<2x8x8xbf16>
    "tpu.trace_start"() <{level = 10 : i32, message = "bqd,bkd->bqk"}> : () -> ()
    %cst_94 = arith.constant dense<0.000000e+00> : vector<2x8x8xf32>
    %143 = tpu.matmul %138, %140, %cst_94 {dimension_numbers = #tpu.dot_dimension_numbers<[2], [2], [1], [1], [0, 0, 0, 1, 1, 1], [0], [0]>} : vector<2x8x8xbf16>, vector<2x8x8xbf16>, vector<2x8x8xf32> -> vector<2x8x8xf32>
    "tpu.trace_stop"() : () -> ()
    %144 = arith.addf %143, %14 : vector<2x8x8xf32>
    %cst_95 = arith.constant dense<0xFF800000> : vector<2x8xf32>
    %145 = vector.multi_reduction <maximumf>, %144, %cst_95 [2] : vector<2x8x8xf32> to vector<2x8xf32>
    %146 = vector.shape_cast %145 : vector<2x8xf32> to vector<2x8x1xf32>
    %147 = vector.broadcast %146 : vector<2x8x1xf32> to vector<2x8x8xf32>
    %148 = arith.subf %144, %147 : vector<2x8x8xf32>
    %149 = math.exp %148 : vector<2x8x8xf32>
    %cst_96 = arith.constant dense<0.000000e+00> : vector<2x8xf32>
    %150 = vector.multi_reduction <add>, %149, %cst_96 [2] : vector<2x8x8xf32> to vector<2x8xf32>
    %151 = vector.shape_cast %150 : vector<2x8xf32> to vector<2x8x1xf32>
    %152 = tpu.reciprocal %151 {approx = true} : vector<2x8x1xf32> -> vector<2x8x1xf32>
    %153 = vector.broadcast %152 : vector<2x8x1xf32> to vector<2x8x8xf32>
    %154 = arith.mulf %149, %153 : vector<2x8x8xf32>
    %155 = arith.truncf %154 : vector<2x8x8xf32> to vector<2x8x8xbf16>
    "tpu.trace_start"() <{level = 10 : i32, message = "bqk,bkd->bqd"}> : () -> ()
    %cst_97 = arith.constant dense<0.000000e+00> : vector<2x8x8xf32>
    %156 = tpu.matmul %155, %142, %cst_97 {dimension_numbers = #tpu.dot_dimension_numbers<[2], [1], [1], [2], [0, 0, 0, 1, 1, 2], [0], [0]>} : vector<2x8x8xbf16>, vector<2x8x8xbf16>, vector<2x8x8xf32> -> vector<2x8x8xf32>
    "tpu.trace_stop"() : () -> ()
    %157 = vector.shape_cast %156 : vector<2x8x8xf32> to vector<16x8xf32>
    %158 = arith.truncf %157 : vector<16x8xf32> to vector<16x8xbf16>
    %c2_98 = arith.constant 2 : index
    %c0_99 = arith.constant 0 : index
    %c0_100 = arith.constant 0 : index
    %159 = vector.load %arg11[%c2_98, %c0_99, %c0_100] : memref<4x8x32xbf16, #tpu.memory_space<vmem>>, vector<1x8x32xbf16>
    %160 = vector.shape_cast %159 : vector<1x8x32xbf16> to vector<8x32xbf16>
    %cst_101 = arith.constant dense<0.000000e+00> : vector<16x32xf32>
    %161 = tpu.matmul %158, %160, %cst_101 {dimension_numbers = #tpu.dot_dimension_numbers<[1], [0], [0], [1], [0, 0, 1, 1], [], []>} : vector<16x8xbf16>, vector<8x32xbf16>, vector<16x32xf32> -> vector<16x32xf32>
    %162 = arith.addf %113, %161 : vector<16x32xf32>
    %c3 = arith.constant 3 : index
    %c0_102 = arith.constant 0 : index
    %c0_103 = arith.constant 0 : index
    %163 = vector.load %arg5[%c3, %c0_102, %c0_103] : memref<4x32x8xbf16, #tpu.memory_space<vmem>>, vector<1x32x8xbf16>
    %164 = vector.shape_cast %163 : vector<1x32x8xbf16> to vector<32x8xbf16>
    %cst_104 = arith.constant dense<0.000000e+00> : vector<16x8xf32>
    %165 = tpu.matmul %2, %164, %cst_104 {dimension_numbers = #tpu.dot_dimension_numbers<[1], [0], [0], [1], [0, 0, 1, 1], [], []>} : vector<16x32xbf16>, vector<32x8xbf16>, vector<16x8xf32> -> vector<16x8xf32>
    %c3_105 = arith.constant 3 : index
    %c0_106 = arith.constant 0 : index
    %c0_107 = arith.constant 0 : index
    %166 = vector.load %arg6[%c3_105, %c0_106, %c0_107] : memref<4x1x8xf32, #tpu.memory_space<vmem>>, vector<1x1x8xf32>
    %167 = vector.shape_cast %166 : vector<1x1x8xf32> to vector<1x8xf32>
    %168 = vector.broadcast %167 : vector<1x8xf32> to vector<16x8xf32>
    %169 = arith.addf %165, %168 : vector<16x8xf32>
    %cst_108 = arith.constant 0.353553385 : f32
    %170 = vector.broadcast %cst_108 : f32 to vector<16x8xf32>
    %171 = arith.mulf %169, %170 : vector<16x8xf32>
    %c3_109 = arith.constant 3 : index
    %c0_110 = arith.constant 0 : index
    %c0_111 = arith.constant 0 : index
    %172 = vector.load %arg7[%c3_109, %c0_110, %c0_111] : memref<4x32x8xbf16, #tpu.memory_space<vmem>>, vector<1x32x8xbf16>
    %173 = vector.shape_cast %172 : vector<1x32x8xbf16> to vector<32x8xbf16>
    %cst_112 = arith.constant dense<0.000000e+00> : vector<16x8xf32>
    %174 = tpu.matmul %5, %173, %cst_112 {dimension_numbers = #tpu.dot_dimension_numbers<[1], [0], [0], [1], [0, 0, 1, 1], [], []>} : vector<16x32xbf16>, vector<32x8xbf16>, vector<16x8xf32> -> vector<16x8xf32>
    %c3_113 = arith.constant 3 : index
    %c0_114 = arith.constant 0 : index
    %c0_115 = arith.constant 0 : index
    %175 = vector.load %arg8[%c3_113, %c0_114, %c0_115] : memref<4x1x8xf32, #tpu.memory_space<vmem>>, vector<1x1x8xf32>
    %176 = vector.shape_cast %175 : vector<1x1x8xf32> to vector<1x8xf32>
    %177 = vector.broadcast %176 : vector<1x8xf32> to vector<16x8xf32>
    %178 = arith.addf %174, %177 : vector<16x8xf32>
    %c3_116 = arith.constant 3 : index
    %c0_117 = arith.constant 0 : index
    %c0_118 = arith.constant 0 : index
    %179 = vector.load %arg9[%c3_116, %c0_117, %c0_118] : memref<4x32x8xbf16, #tpu.memory_space<vmem>>, vector<1x32x8xbf16>
    %180 = vector.shape_cast %179 : vector<1x32x8xbf16> to vector<32x8xbf16>
    %cst_119 = arith.constant dense<0.000000e+00> : vector<16x8xf32>
    %181 = tpu.matmul %8, %180, %cst_119 {dimension_numbers = #tpu.dot_dimension_numbers<[1], [0], [0], [1], [0, 0, 1, 1], [], []>} : vector<16x32xbf16>, vector<32x8xbf16>, vector<16x8xf32> -> vector<16x8xf32>
    %c3_120 = arith.constant 3 : index
    %c0_121 = arith.constant 0 : index
    %c0_122 = arith.constant 0 : index
    %182 = vector.load %arg10[%c3_120, %c0_121, %c0_122] : memref<4x1x8xf32, #tpu.memory_space<vmem>>, vector<1x1x8xf32>
    %183 = vector.shape_cast %182 : vector<1x1x8xf32> to vector<1x8xf32>
    %184 = vector.broadcast %183 : vector<1x8xf32> to vector<16x8xf32>
    %185 = arith.addf %181, %184 : vector<16x8xf32>
    %186 = vector.shape_cast %171 : vector<16x8xf32> to vector<2x8x8xf32>
    %187 = arith.truncf %186 : vector<2x8x8xf32> to vector<2x8x8xbf16>
    %188 = vector.shape_cast %178 : vector<16x8xf32> to vector<2x8x8xf32>
    %189 = arith.truncf %188 : vector<2x8x8xf32> to vector<2x8x8xbf16>
    %190 = vector.shape_cast %185 : vector<16x8xf32> to vector<2x8x8xf32>
    %191 = arith.truncf %190 : vector<2x8x8xf32> to vector<2x8x8xbf16>
    "tpu.trace_start"() <{level = 10 : i32, message = "bqd,bkd->bqk"}> : () -> ()
    %cst_123 = arith.constant dense<0.000000e+00> : vector<2x8x8xf32>
    %192 = tpu.matmul %187, %189, %cst_123 {dimension_numbers = #tpu.dot_dimension_numbers<[2], [2], [1], [1], [0, 0, 0, 1, 1, 1], [0], [0]>} : vector<2x8x8xbf16>, vector<2x8x8xbf16>, vector<2x8x8xf32> -> vector<2x8x8xf32>
    "tpu.trace_stop"() : () -> ()
    %193 = arith.addf %192, %14 : vector<2x8x8xf32>
    %cst_124 = arith.constant dense<0xFF800000> : vector<2x8xf32>
    %194 = vector.multi_reduction <maximumf>, %193, %cst_124 [2] : vector<2x8x8xf32> to vector<2x8xf32>
    %195 = vector.shape_cast %194 : vector<2x8xf32> to vector<2x8x1xf32>
    %196 = vector.broadcast %195 : vector<2x8x1xf32> to vector<2x8x8xf32>
    %197 = arith.subf %193, %196 : vector<2x8x8xf32>
    %198 = math.exp %197 : vector<2x8x8xf32>
    %cst_125 = arith.constant dense<0.000000e+00> : vector<2x8xf32>
    %199 = vector.multi_reduction <add>, %198, %cst_125 [2] : vector<2x8x8xf32> to vector<2x8xf32>
    %200 = vector.shape_cast %199 : vector<2x8xf32> to vector<2x8x1xf32>
    %201 = tpu.reciprocal %200 {approx = true} : vector<2x8x1xf32> -> vector<2x8x1xf32>
    %202 = vector.broadcast %201 : vector<2x8x1xf32> to vector<2x8x8xf32>
    %203 = arith.mulf %198, %202 : vector<2x8x8xf32>
    %204 = arith.truncf %203 : vector<2x8x8xf32> to vector<2x8x8xbf16>
    "tpu.trace_start"() <{level = 10 : i32, message = "bqk,bkd->bqd"}> : () -> ()
    %cst_126 = arith.constant dense<0.000000e+00> : vector<2x8x8xf32>
    %205 = tpu.matmul %204, %191, %cst_126 {dimension_numbers = #tpu.dot_dimension_numbers<[2], [1], [1], [2], [0, 0, 0, 1, 1, 2], [0], [0]>} : vector<2x8x8xbf16>, vector<2x8x8xbf16>, vector<2x8x8xf32> -> vector<2x8x8xf32>
    "tpu.trace_stop"() : () -> ()
    %206 = vector.shape_cast %205 : vector<2x8x8xf32> to vector<16x8xf32>
    %207 = arith.truncf %206 : vector<16x8xf32> to vector<16x8xbf16>
    %c3_127 = arith.constant 3 : index
    %c0_128 = arith.constant 0 : index
    %c0_129 = arith.constant 0 : index
    %208 = vector.load %arg11[%c3_127, %c0_128, %c0_129] : memref<4x8x32xbf16, #tpu.memory_space<vmem>>, vector<1x8x32xbf16>
    %209 = vector.shape_cast %208 : vector<1x8x32xbf16> to vector<8x32xbf16>
    %cst_130 = arith.constant dense<0.000000e+00> : vector<16x32xf32>
    %210 = tpu.matmul %207, %209, %cst_130 {dimension_numbers = #tpu.dot_dimension_numbers<[1], [0], [0], [1], [0, 0, 1, 1], [], []>} : vector<16x8xbf16>, vector<8x32xbf16>, vector<16x32xf32> -> vector<16x32xf32>
    %211 = arith.addf %162, %210 : vector<16x32xf32>
    %212 = vector.shape_cast %56 : vector<2x8x8xf32> to vector<2x1x8x8xf32>
    %213 = vector.shape_cast %105 : vector<2x8x8xf32> to vector<2x1x8x8xf32>
    %214 = vector.shape_cast %154 : vector<2x8x8xf32> to vector<2x1x8x8xf32>
    %215 = vector.shape_cast %203 : vector<2x8x8xf32> to vector<2x1x8x8xf32>
    %216 = tpu.concatenate %212, %213, %214, %215 in 1 : vector<2x1x8x8xf32>, vector<2x1x8x8xf32>, vector<2x1x8x8xf32>, vector<2x1x8x8xf32> -> vector<2x4x8x8xf32>
    %c0_131 = arith.constant 0 : index
    %c0_132 = arith.constant 0 : index
    %c0_133 = arith.constant 0 : index
    %c0_134 = arith.constant 0 : index
    %217 = vector.load %arg14[%c0_131, %c0_132, %c0_133, %c0_134] : memref<2x4x8x8xf32, #tpu.memory_space<vmem>>, vector<2x4x8x8xf32>
    tpu.vector_store %arg14[%c0_131, %c0_132, %c0_133, %c0_134], %216 {strides = array<i32>} : memref<2x4x8x8xf32, #tpu.memory_space<vmem>>, vector<2x4x8x8xf32>,
    %c0_135 = arith.constant 0 : index
    %c0_136 = arith.constant 0 : index
    %218 = vector.load %arg12[%c0_135, %c0_136] : memref<1x32xf32, #tpu.memory_space<vmem>>, vector<1x32xf32>
    %219 = vector.broadcast %218 : vector<1x32xf32> to vector<16x32xf32>
    %220 = arith.addf %211, %219 : vector<16x32xf32>
    %221 = vector.shape_cast %220 : vector<16x32xf32> to vector<2x8x32xf32>
    %c0_137 = arith.constant 0 : index
    %c0_138 = arith.constant 0 : index
    %c0_139 = arith.constant 0 : index
    %222 = vector.load %arg13[%c0_137, %c0_138, %c0_139] : memref<2x8x32xf32, #tpu.memory_space<vmem>>, vector<2x8x32xf32>
    tpu.vector_store %arg13[%c0_137, %c0_138, %c0_139], %221 {strides = array<i32>} : memref<2x8x32xf32, #tpu.memory_space<vmem>>, vector<2x8x32xf32>,
    return
  }
  func.func @transform_0(%arg0: i32) -> (i32, i32, i32) {
    %c0_i32 = arith.constant 0 : i32
    %c0_i32_0 = arith.constant 0 : i32
    %c0_i32_1 = arith.constant 0 : i32
    return %arg0, %c0_i32, %c0_i32_0 : i32, i32, i32
  }
  func.func @transform_1(%arg0: i32) -> (i32, i32, i32) {
    %c0_i32 = arith.constant 0 : i32
    %c0_i32_0 = arith.constant 0 : i32
    %c0_i32_1 = arith.constant 0 : i32
    return %arg0, %c0_i32, %c0_i32_0 : i32, i32, i32
  }
  func.func @transform_2(%arg0: i32) -> (i32, i32, i32) {
    %c0_i32 = arith.constant 0 : i32
    %c0_i32_0 = arith.constant 0 : i32
    %c0_i32_1 = arith.constant 0 : i32
    return %arg0, %c0_i32, %c0_i32_0 : i32, i32, i32
  }
  func.func @transform_3(%arg0: i32) -> (i32, i32, i32) {
    %c0_i32 = arith.constant 0 : i32
    %c0_i32_0 = arith.constant 0 : i32
    %c0_i32_1 = arith.constant 0 : i32
    return %arg0, %c0_i32, %c0_i32_0 : i32, i32, i32
  }
  func.func @transform_4(%arg0: i32) -> (i32, i32, i32) {
    %c0_i32 = arith.constant 0 : i32
    %c0_i32_0 = arith.constant 0 : i32
    %c0_i32_1 = arith.constant 0 : i32
    %c0_i32_2 = arith.constant 0 : i32
    return %c0_i32, %c0_i32_0, %c0_i32_1 : i32, i32, i32
  }
  func.func @transform_5(%arg0: i32) -> (i32, i32, i32) {
    %c0_i32 = arith.constant 0 : i32
    %c0_i32_0 = arith.constant 0 : i32
    %c0_i32_1 = arith.constant 0 : i32
    %c0_i32_2 = arith.constant 0 : i32
    return %c0_i32, %c0_i32_0, %c0_i32_1 : i32, i32, i32
  }
  func.func @transform_6(%arg0: i32) -> (i32, i32, i32) {
    %c0_i32 = arith.constant 0 : i32
    %c0_i32_0 = arith.constant 0 : i32
    %c0_i32_1 = arith.constant 0 : i32
    %c0_i32_2 = arith.constant 0 : i32
    return %c0_i32, %c0_i32_0, %c0_i32_1 : i32, i32, i32
  }
  func.func @transform_7(%arg0: i32) -> (i32, i32, i32) {
    %c0_i32 = arith.constant 0 : i32
    %c0_i32_0 = arith.constant 0 : i32
    %c0_i32_1 = arith.constant 0 : i32
    %c0_i32_2 = arith.constant 0 : i32
    return %c0_i32, %c0_i32_0, %c0_i32_1 : i32, i32, i32
  }
  func.func @transform_8(%arg0: i32) -> (i32, i32, i32) {
    %c0_i32 = arith.constant 0 : i32
    %c0_i32_0 = arith.constant 0 : i32
    %c0_i32_1 = arith.constant 0 : i32
    %c0_i32_2 = arith.constant 0 : i32
    return %c0_i32, %c0_i32_0, %c0_i32_1 : i32, i32, i32
  }
  func.func @transform_9(%arg0: i32) -> (i32, i32, i32) {
    %c0_i32 = arith.constant 0 : i32
    %c0_i32_0 = arith.constant 0 : i32
    %c0_i32_1 = arith.constant 0 : i32
    %c0_i32_2 = arith.constant 0 : i32
    return %c0_i32, %c0_i32_0, %c0_i32_1 : i32, i32, i32
  }
  func.func @transform_10(%arg0: i32) -> (i32, i32, i32) {
    %c0_i32 = arith.constant 0 : i32
    %c0_i32_0 = arith.constant 0 : i32
    %c0_i32_1 = arith.constant 0 : i32
    %c0_i32_2 = arith.constant 0 : i32
    return %c0_i32, %c0_i32_0, %c0_i32_1 : i32, i32, i32
  }
  func.func @transform_11(%arg0: i32) -> (i32, i32) {
    %c0_i32 = arith.constant 0 : i32
    %c0_i32_0 = arith.constant 0 : i32
    %c0_i32_1 = arith.constant 0 : i32
    return %c0_i32, %c0_i32_0 : i32, i32
  }
  func.func @transform_12(%arg0: i32) -> (i32, i32, i32) {
    %c0_i32 = arith.constant 0 : i32
    %c0_i32_0 = arith.constant 0 : i32
    %c0_i32_1 = arith.constant 0 : i32
    return %arg0, %c0_i32, %c0_i32_0 : i32, i32, i32
  }
  func.func @transform_13(%arg0: i32) -> (i32, i32, i32, i32) {
    %c0_i32 = arith.constant 0 : i32
    %c0_i32_0 = arith.constant 0 : i32
    %c0_i32_1 = arith.constant 0 : i32
    %c0_i32_2 = arith.constant 0 : i32
    return %arg0, %c0_i32, %c0_i32_0, %c0_i32_1 : i32, i32, i32, i32
  }
}

</mosaic_0001>

<bundles_post_ra>
// kernel: tpu_custom_call.1
= control target key start
LH: loop header
LB: loop body
LE: loop exit
PB: predicated region body
PF: predicated region fallthrough
CT: control target
= control target key end

     0   :  { %19 = vsyncpa [#allocation3], 0  ;;  %v2493_v1 = vmov 0.0   ;;  %vm2494_vm0 = vmmov 0   ;;  %vm84_vm1 = vcmask 261120   ;;  %s2966_s0 = inlined_call_operand.vmem [shape: f32[2,8,32], index: 0, kind: input, shape index: {}]   ;;  %s2967_s1 = inlined_call_operand.vmem [shape: f32[2,8,32], index: 1, kind: input, shape index: {}]   ;;  %s2968_s2 = inlined_call_operand.vmem [shape: f32[2,8,32], index: 2, kind: input, shape index: {}]   ;;  %s2969_s3 = inlined_call_operand.vmem [shape: f32[2,8,8], index: 3, kind: input, shape index: {}]   ;;  %s2970_s4 = inlined_call_operand.vmem [shape: bf16[4,32,8], index: 4, kind: input, shape index: {}]   ;;  %s2971_s5 = inlined_call_operand.vmem [shape: f32[4,1,8], index: 5, kind: input, shape index: {}]   ;;  %s2972_s6 = inlined_call_operand.vmem [shape: bf16[4,32,8], index: 6, kind: input, shape index: {}]   ;;  %s2973_s7 = inlined_call_operand.vmem [shape: f32[4,1,8], index: 7, kind: input, shape index: {}]   ;;  %s2974_s8 = inlined_call_operand.vmem [shape: bf16[4,32,8], index: 8, kind: input, shape index: {}]   ;;  %s2975_s9 = inlined_call_operand.vmem [shape: f32[4,1,8], index: 9, kind: input, shape index: {}]   ;;  %s2976_s10 = inlined_call_operand.vmem [shape: bf16[4,8,32], index: 10, kind: input, shape index: {}]   ;;  %s2977_s11 = inlined_call_operand.vmem [shape: f32[1,32], index: 11, kind: input, shape index: {}]   ;;  %s2978_s12 = inlined_call_operand.hbm [shape: f32[2,8,32], index: 12, kind: output, shape index: {0}]   ;;  %s2979_s13 = inlined_call_operand.hbm [shape: f32[2,4,8,8], index: 13, kind: output, shape index: {1}]  }
   0x1   :  { %v2393_v0 = vld [vmem:[%s2970_s4 + $0x8] sm:$0xff]   ;;  %2170 = vmatprep.subr.bf16.mxu0 %v2493_v1  ;;  %2178 = vmatprep.subr.bf16.mxu1 %v2493_v1  ;;  %v2395_v3 = vld [vmem:[%s2970_s4] sm:$0xff]  }
   0x2   :  { %v2394_v2 = vld [vmem:[%s2972_s6 + $0x8] sm:$0xff]   ;;  %2171 = vmatpush3.bf16.msra.mxu0 %v2393_v0  ;;  %2174 = vmatprep.mubr.msk.bf16.mxu0 %vm2494_vm0, %v2493_v1  ;;  %v2396_v4 = vld [vmem:[%s2972_s6] sm:$0xff]  }
   0x3   :  { %2179 = vmatpush3.bf16.msra.mxu1 %v2394_v2  ;;  %2172 = vmatprep.subr.bf16.mxu0 %v2493_v1  ;;  %v46_v5 = vld [vmem:[%s2966_s0] sm:$0xff]  ;;  %v47_v6 = vld [vmem:[%s2966_s0 + $0x8] sm:$0xff] }
   0x4   :  { %2180 = vmatprep.subr.bf16.mxu1 %v2493_v1  ;;  %2182 = vmatprep.mubr.msk.bf16.mxu1 %vm2494_vm0, %v2493_v1  ;;  %v49_v7 = vld [vmem:[%s2967_s1] sm:$0xff]  ;;  %v2599_v8 = vpack.c.bf16 %v47_v6, %v46_v5  ;;  %v50_v9 = vld [vmem:[%s2967_s1 + $0x8] sm:$0xff] }
   0x5   :  { %v2604_v10 = vpack.c.bf16 %v50_v9, %v49_v7  ;;  %v2397_v11 = vld [vmem:[%s2974_s8 + $0x8] sm:$0xff]  }
   0x6   :  { %2173 = vmatpush3.bf16.msra.mxu0 %v2395_v3 }
   0x7   :  { %2181 = vmatpush3.bf16.msra.mxu1 %v2396_v4  ;;  %2186 = vmatprep.subr.bf16.mxu0 %v2493_v1 }
   0x8   :  { %2194 = vmatprep.subr.bf16.mxu1 %v2493_v1 }
   0x9   :  { %2175 = vmatmul.mubr.msk.bf16.vlgmr.msra.gmra.mxu0 %vm84_vm1, %v2599_v8 }
   0xa   :  { %2183 = vmatmul.mubr.msk.bf16.vlgmr.msra.gmra.mxu1 %vm84_vm1, %v2604_v10  ;;  %2187 = vmatpush3.bf16.msra.mxu0 %v2397_v11 }
   0xb   :  { %2188 = vmatprep.subr.bf16.mxu0 %v2493_v1  ;;  %2190 = vmatprep.mubr.msk.bf16.mxu0 %vm2494_vm0, %v2493_v1 }
   0xc   :  { %2196 = vmatprep.mubr.msk.bf16.mxu1 %vm2494_vm0, %v2493_v1 }
   0xd   :  { %20 = vsyncpa [#allocation5], 0  ;;  %v2398_v12 = vld [vmem:[%s2974_s8] sm:$0xff]   ;;  %v53_v14 = vld [vmem:[%s2968_s2 + $0x8] sm:$0xff]  ;;  %vm271_vm2 = vcmask 64512   ;;  %vm391_vm3 = vcmask 1043456  }
   0xe   :  { %2189 = vmatpush3.bf16.msra.mxu0 %v2398_v12  ;;  %v52_v13 = vld [vmem:[%s2968_s2] sm:$0xff]  ;;  %v56_v49 = vld [vmem:[%s2969_s3 + $0x8] sm:$0xff]  ;;  %v2495_v53 = vmov -1e+30   ;;  %s2496_s16 = smov [#allocation4]  }
   0xf   :  { %v2629_v15 = vpack.c.bf16 %v53_v14, %v52_v13  ;;  %2200 = vmatprep.subr.bf16.mxu0 %v2493_v1  ;;  %v1977_v16 = vld [vmem:[%s2971_s5] ss:$0 sm:$0xff]  ;;  %vm58_vm4 = vcmp.ne.f32.partialorder %v56_v49, 0.0  ;;  %s1962_s2 = sshll.u32 %s2496_s16, 4  ;;  %s1963_s2 = int_to_ptr.vmem [resolvable:$true] %s1962_s2 }
  0x10   :  { %v1981_v17 = vld [vmem:[%s2973_s7] ss:$0 sm:$0xff]  ;;  %v2665_v54 = vsel %vm58_vm4, 0.0, %v2495_v53  ;;  %s2449_s17 = scalar_lea.vmem %s1963_s2, 1024  ;;  %p2454_p1 = scmp.lt.s32.totalorder %s1963_s2, %s1963_s2 }
  0x11   :  { %2191 = vmatmul.mubr.msk.bf16.vlgmr.msra.gmra.mxu0 %vm84_vm1, %v2629_v15  ;;  %v1985_v38 = vld [vmem:[%s2975_s9] ss:$0 sm:$0xff]  ;;  %p2450_p0 = scmp.ne.s32.totalorder %s1963_s2, %s2449_s17  ;;  %p2455_p2 = scmp.lt.s32.totalorder %s2449_s17, %s2449_s17 }
  0x12   :  { %2202 = vmatprep.mubr.msk.bf16.mxu0 %vm2494_vm0, %v2493_v1  ;;  %v55_v50 = vld [vmem:[%s2969_s3] sm:$0xff] }
  0x13   :  { %vm57_vm5 = vcmp.ne.f32.partialorder %v55_v50, 0.0  ;;  %p2456_p3 = por %p2455_p2, %p2454_p1 }
  0x14   :  { %v2667_v55 = vsel %vm57_vm5, 0.0, %v2495_v53 }
  0x15   :  { %p2457_p4 = pnand %p2456_p3, %p2450_p0 }
  0xc9   :  { %v122_v18 = vpop.f32.mrf.mxu0 }
  0xca   :  { %v191_v19 = vpop.f32.mrf.mxu1  ;;  %v123_v20 = vadd.f32 %v1977_v16, %v122_v18 }
  0xcb   :  { %v192_v21 = vadd.f32 %v1981_v17, %v191_v19  ;;  %v2176_v22 = vpop.f32.mrf.mxu0 }
  0xcc   :  { %v2184_v23 = vpop.f32.mrf.mxu1  ;;  %v129_v27 = vmul.f32 0.35355338, %v123_v20  ;;  %v2399_v20 = vld [vmem:[%s2972_s6 + $0x18] sm:$0xff]  }
  0xcd   :  { %v267_v24 = vpack.c.bf16 %v192_v21, %v192_v21  ;;  %v125_v25 = vpop.f32.mrf.mxu0 }
  0xce   :  { %v194_v26 = vpop.f32.mrf.mxu1  ;;  %v126_v32 = vadd.f32 %v1977_v16, %v125_v25  ;;  %v265_v34 = vpack.c.bf16 %v129_v27, %v129_v27  ;;  %v2401_v25 = vld [vmem:[%s2972_s6 + $0x10] sm:$0xff]  }
  0xcf   :  { %v276_v28 = vsel %vm271_vm2, %v267_v24, 0  ;;  %v195_v29 = vadd.f32 %v1981_v17, %v194_v26  ;;  %v2177_v30 = vpop.f32.mrf.mxu0  ;;  %v2400_v24 = vld [vmem:[%s2970_s4 + $0x18] sm:$0xff]   ;;  %v2402_v27 = vld [vmem:[%s2970_s4 + $0x10] sm:$0xff]  }
  0xd0   :  { %v2185_v31 = vpop.f32.mrf.mxu1  ;;  %2195 = vmatpush3.bf16.xpose.msra.mxu1 %v276_v28  ;;  %v130_v36 = vmul.f32 0.35355338, %v126_v32  ;;  %v2403_v28 = vld [vmem:[%s2974_s8 + $0x18] sm:$0xff]  }
  0xd1   :  { %v268_v33 = vpack.c.bf16 %v195_v29, %v195_v29  ;;  %2206 = vmatprep.subr.bf16.mxu1 %v2493_v1  ;;  %v258_v39 = vpop.f32.mrf.mxu0  ;;  %v2404_v29 = vld [vmem:[%s2974_s8 + $0x10] sm:$0xff]  }
  0xd2   :  { %v266_v37 = vpack.c.bf16 %v130_v36, %v130_v36  ;;  %v259_v40 = vadd.f32 %v1985_v38, %v258_v39 }
  0xd3   :  { %v322_v35 = vsel %vm271_vm2, %v268_v33, 0  ;;  %v2192_v41 = vpop.f32.mrf.mxu0 }
  0xd4   :  { %2201 = vmatpush3.bf16.xpose.msra.mxu0 %v322_v35  ;;  %v269_v42 = vpack.c.bf16 %v259_v40, %v259_v40 }
  0xd5   :  { %2212 = vmatprep.subr.bf16.mxu0 %v2493_v1  ;;  %v261_v43 = vpop.f32.mrf.mxu0 }
  0xd6   :  { %v393_v44 = vsel %vm391_vm3, %v269_v42, 0  ;;  %v262_v45 = vadd.f32 %v1985_v38, %v261_v43  ;;  %v1998_v43 = vld [vmem:[%s2971_s5 + $0x1] ss:$0 sm:$0xff] }
  0xd7   :  { %2197 = vmatmul.mubr.msk.bf16.vlgmr.msra.gmra.mxu1 %vm271_vm2, %v265_v34  ;;  %v2193_v46 = vpop.f32.mrf.mxu0 }
  0xd8   :  { %2208 = vmatprep.mubr.msk.bf16.mxu1 %vm2494_vm0, %v2493_v1  ;;  %2207 = vmatpush3.bf16.msra.mxu1 %v393_v44  ;;  %v270_v47 = vpack.c.bf16 %v262_v45, %v262_v45 }
  0xd9   :  { %2218 = vmatprep.subr.bf16.mxu1 %v2493_v1 }
  0xda   :  { %v439_v48 = vsel %vm391_vm3, %v270_v47, 0 }
  0xdb   :  { %2203 = vmatmul.mubr.msk.bf16.vlgmr.msra.gmra.mxu0 %vm271_vm2, %v266_v37  ;;  %v2007_v37 = vld [vmem:[%s2973_s7 + $0x1] ss:$0 sm:$0xff] }
  0xdc   :  { %2214 = vmatprep.mubr.msk.bf16.mxu0 %vm2494_vm0, %v2493_v1  ;;  %2213 = vmatpush3.bf16.msra.mxu0 %v439_v48 }
  0xdd   :  { %2226 = vmatprep.subr.bf16.mxu0 %v2493_v1 }
 0x197   :  { %v312_v51 = vpop.f32.mrf.mxu1 }
 0x198   :  { %v313_v61 = vadd.f32 %v312_v51, %v2667_v55 }
 0x199   :  { %v2198_v52 = vpop.f32.mrf.mxu1 }
 0x19a   :  { %v364_v2 = vsel %vm271_vm2, %v313_v61, -inf }
 0x19b   :  { %v315_v56 = vpop.f32.mrf.mxu1  ;;  %v358_v57 = vpop.f32.mrf.mxu0 }
 0x19c   :  { %v359_v58 = vadd.f32 %v358_v57, %v2665_v54 }
 0x19d   :  { %v2199_v59 = vpop.f32.mrf.mxu1  ;;  %v2204_v60 = vpop.f32.mrf.mxu0 }
 0x19e   :  { %v367_v62 = vsel %vm271_vm2, %v359_v58, -inf }
 0x19f   :  { %368 = vmax.xlane.f32.xlu0 %v367_v62  ;;  %v361_v63 = vpop.f32.mrf.mxu0 }
 0x1a0   :  { %v2016_v63 = vld [vmem:[%s2975_s9 + $0x1] ss:$0 sm:$0xff] }
 0x1a1   :  { %v2205_v0 = vpop.f32.mrf.mxu0 }
 0x1a3   :  { %365 = vmax.xlane.f32.xlu0 %v364_v2 }
 0x228   :  { %v369_v3 = vpop.xlane.xlu0 %368 }
 0x229   :  { %v371_v4 = vsub.f32 %v359_v58, %v369_v3 }
 0x22b   :  { %v374_v5 = vmul.f32 1.442695, %v371_v4 }
 0x22c   :  { %v366_v6 = vpop.xlane.xlu0 %365 }
 0x22d   :  { %2417 = vpow2.f32 %v374_v5  ;;  %v370_v7 = vsub.f32 %v313_v61, %v366_v6 }
 0x22f   :  { %v372_v9 = vmul.f32 1.442695, %v370_v7 }
 0x231   :  { %2419 = vpow2.f32 %v372_v9 }
 0x23a   :  { %v2418_v11 = vpop.eup %2417 }
 0x23b   :  { %v379_v12 = vsel %vm271_vm2, %v2418_v11, 0.0 }
 0x23c   :  { %380 = vadd.xlane.f32.xlu1 %v379_v12 }
 0x23e   :  { %v2420_v13 = vpop.eup %2419 }
 0x23f   :  { %v376_v14 = vsel %vm271_vm2, %v2420_v13, 0.0 }
 0x240   :  { %377 = vadd.xlane.f32.xlu1 %v376_v14 }
 0x2c5   :  { %v381_v16 = vpop.xlane.xlu1 %380 }
 0x2c6   :  { %2421 = vrcp.f32 %v381_v16 }
 0x2c9   :  { %v378_v17 = vpop.xlane.xlu1 %377 }
 0x2ca   :  { %2423 = vrcp.f32 %v378_v17 }
 0x2d3   :  { %v2422_v18 = vpop.eup %2421 }
 0x2d4   :  { %v385_v19 = vmul.f32 %v2422_v18, %v2418_v11 }
 0x2d6   :  { %v387_v21 = vpack.c.bf16 %v385_v19, %v385_v19  ;;  %1930 = vst.msk [vmem:[#allocation4 + $0x20] sm:$0xff] %vm271_vm2, %v385_v19 }
 0x2d7   :  { %v2424_v22 = vpop.eup %2423 }
 0x2d8   :  { %2215 = vmatmul.mubr.msk.bf16.vlgmr.msra.gmra.mxu0 %vm271_vm2, %v387_v21  ;;  %v384_v23 = vmul.f32 %v2424_v22, %v2420_v13 }
 0x2d9   :  { %2227 = vmatpush3.bf16.msra.mxu0 %v2399_v20  ;;  %2230 = vmatprep.mubr.msk.bf16.mxu0 %vm2494_vm0, %v2493_v1 }
 0x2da   :  { %v386_v26 = vpack.c.bf16 %v384_v23, %v384_v23  ;;  %1926 = vst.msk [vmem:[#allocation4] sm:$0xff] %vm271_vm2, %v384_v23  ;;  %2228 = vmatprep.subr.bf16.mxu0 %v2493_v1 }
 0x2dc   :  { %2209 = vmatmul.mubr.msk.bf16.vlgmr.msra.gmra.mxu1 %vm271_vm2, %v386_v26 }
 0x2dd   :  { %2219 = vmatpush3.bf16.msra.mxu1 %v2400_v24  ;;  %2229 = vmatpush3.bf16.msra.mxu0 %v2401_v25 }
 0x2de   :  { %2220 = vmatprep.subr.bf16.mxu1 %v2493_v1  ;;  %2222 = vmatprep.mubr.msk.bf16.mxu1 %vm2494_vm0, %v2493_v1 }
 0x2df   :  { %2242 = vmatprep.subr.bf16.mxu0 %v2493_v1 }
 0x2e0   :  { %2231 = vmatmul.mubr.msk.bf16.vlgmr.msra.gmra.mxu0 %vm84_vm1, %v2604_v10 }
 0x2e1   :  { %2221 = vmatpush3.bf16.msra.mxu1 %v2402_v27  ;;  %2244 = vmatprep.mubr.msk.bf16.mxu0 %vm2494_vm0, %v2493_v1 }
 0x2e2   :  { %2234 = vmatprep.subr.bf16.mxu1 %v2493_v1 }
 0x2e4   :  { %2223 = vmatmul.mubr.msk.bf16.vlgmr.msra.gmra.mxu1 %vm84_vm1, %v2599_v8 }
 0x2e5   :  { %2238 = vmatprep.mubr.msk.bf16.mxu1 %vm2494_vm0, %v2493_v1  ;;  %2235 = vmatpush3.bf16.msra.mxu1 %v2403_v28 }
 0x2e6   :  { %2236 = vmatprep.subr.bf16.mxu1 %v2493_v1 }
 0x2e9   :  { %2237 = vmatpush3.bf16.msra.mxu1 %v2404_v29 }
 0x2ea   :  { %2248 = vmatprep.subr.bf16.mxu1 %v2493_v1 }
 0x2ec   :  { %2239 = vmatmul.mubr.msk.bf16.vlgmr.msra.gmra.mxu1 %vm84_vm1, %v2629_v15 }
 0x2ed   :  { %2250 = vmatprep.mubr.msk.bf16.mxu1 %vm2494_vm0, %v2493_v1 }
 0x398   :  { %v2719_v30 = vpop.f32.mrf.mxu0 }
 0x39a   :  { %v2216_v31 = vpop.f32.mrf.mxu0 }
 0x39c   :  { %v2721_v32 = vpop.f32.mrf.mxu1  ;;  %v478_v33 = vpop.f32.mrf.mxu0 }
 0x39d   :  { %v481_v34 = vpack.c.bf16 %v2719_v30, %v2721_v32 }
 0x39e   :  { %v2210_v35 = vpop.f32.mrf.mxu1  ;;  %v2217_v36 = vpop.f32.mrf.mxu0 }
 0x3a0   :  { %v432_v38 = vpop.f32.mrf.mxu1  ;;  %v610_v39 = vpop.f32.mrf.mxu0 }
 0x3a1   :  { %v611_v40 = vadd.f32 %v2007_v37, %v610_v39 }
 0x3a2   :  { %v2211_v41 = vpop.f32.mrf.mxu1  ;;  %v2232_v42 = vpop.f32.mrf.mxu0 }
 0x3a3   :  { %v685_v44 = vpack.c.bf16 %v611_v40, %v611_v40 }
 0x3a4   :  { %v542_v45 = vpop.f32.mrf.mxu1  ;;  %v613_v46 = vpop.f32.mrf.mxu0 }
 0x3a5   :  { %v693_v47 = vsel %vm271_vm2, %v685_v44, 0  ;;  %v543_v48 = vadd.f32 %v1998_v43, %v542_v45  ;;  %v614_v49 = vadd.f32 %v2007_v37, %v613_v46  ;;  %v482_v45 = vld [vmem:[%s2976_s10] sm:$0xf] }
 0x3a6   :  { %v2224_v50 = vpop.f32.mrf.mxu1  ;;  %v2233_v51 = vpop.f32.mrf.mxu0  ;;  %2243 = vmatpush3.bf16.xpose.msra.mxu0 %v693_v47 }
 0x3a7   :  { %v549_v52 = vmul.f32 0.35355338, %v543_v48  ;;  %v686_v53 = vpack.c.bf16 %v614_v49, %v614_v49  ;;  %2254 = vmatprep.subr.bf16.mxu0 %v2493_v1  ;;  %v951_v48 = vsel %vm391_vm3, %v482_v45, 0  ;;  %v2405_v49 = vld [vmem:[%s2972_s6 + $0x28] sm:$0xff]   ;;  %v2406_v50 = vld [vmem:[%s2972_s6 + $0x20] sm:$0xff]  }
 0x3a8   :  { %v545_v56 = vpop.f32.mrf.mxu1  ;;  %v2024_v51 = vld [vmem:[%s2976_s10 + $0x4] sm:$0xf] }
 0x3a9   :  { %v683_v57 = vpack.c.bf16 %v549_v52, %v549_v52  ;;  %v739_v58 = vsel %vm271_vm2, %v686_v53, 0  ;;  %v546_v59 = vadd.f32 %v1998_v43, %v545_v56  ;;  %v904_v52 = vsel %vm391_vm3, %v2024_v51, 0  ;;  %v2407_v56 = vld [vmem:[%s2970_s4 + $0x28] sm:$0xff]  }
 0x3aa   :  { %v2225_v60 = vpop.f32.mrf.mxu1  ;;  %2249 = vmatpush3.bf16.xpose.msra.mxu1 %v739_v58 }
 0x3ab   :  { %v550_v61 = vmul.f32 0.35355338, %v546_v59  ;;  %2260 = vmatprep.subr.bf16.mxu1 %v2493_v1 }
 0x3ac   :  { %v676_v0 = vpop.f32.mrf.mxu1 }
 0x3ad   :  { %2245 = vmatmul.mubr.msk.bf16.vlgmr.msra.gmra.mxu0 %vm271_vm2, %v683_v57  ;;  %v684_v62 = vpack.c.bf16 %v550_v61, %v550_v61  ;;  %v677_v2 = vadd.f32 %v2016_v63, %v676_v0  ;;  %v2408_v61 = vld [vmem:[%s2970_s4 + $0x20] sm:$0xff]   ;;  %v2409_v0 = vld [vmem:[%s2974_s8 + $0x28] sm:$0xff]  }
 0x3ae   :  { %2256 = vmatprep.mubr.msk.bf16.mxu0 %vm2494_vm0, %v2493_v1  ;;  %v2240_v3 = vpop.f32.mrf.mxu1 }
 0x3af   :  { %v687_v4 = vpack.c.bf16 %v677_v2, %v677_v2 }
 0x3b0   :  { %v679_v5 = vpop.f32.mrf.mxu1 }
 0x3b1   :  { %2251 = vmatmul.mubr.msk.bf16.vlgmr.msra.gmra.mxu1 %vm271_vm2, %v684_v62  ;;  %v809_v6 = vsel %vm391_vm3, %v687_v4, 0  ;;  %v680_v7 = vadd.f32 %v2016_v63, %v679_v5  ;;  %v2041_v5 = vld [vmem:[%s2973_s7 + $0x2] ss:$0 sm:$0xff] }
 0x3b2   :  { %2262 = vmatprep.mubr.msk.bf16.mxu1 %vm2494_vm0, %v2493_v1  ;;  %v2241_v9 = vpop.f32.mrf.mxu1  ;;  %2255 = vmatpush3.bf16.msra.mxu0 %v809_v6 }
 0x3b3   :  { %v688_v11 = vpack.c.bf16 %v680_v7, %v680_v7  ;;  %2266 = vmatprep.subr.bf16.mxu0 %v2493_v1 }
 0x3b5   :  { %v855_v12 = vsel %vm391_vm3, %v688_v11, 0 }
 0x3b6   :  { %2261 = vmatpush3.bf16.msra.mxu1 %v855_v12 }
 0x3b7   :  { %2272 = vmatprep.subr.bf16.mxu1 %v2493_v1 }
 0x46d   :  { %v729_v13 = vpop.f32.mrf.mxu0 }
 0x46e   :  { %v730_v14 = vadd.f32 %v729_v13, %v2667_v55  ;;  %v2410_v13 = vld [vmem:[%s2974_s8 + $0x20] sm:$0xff]  }
 0x46f   :  { %v2246_v16 = vpop.f32.mrf.mxu0 }
 0x470   :  { %v781_v17 = vsel %vm271_vm2, %v730_v14, -inf }
 0x471   :  { %v775_v18 = vpop.f32.mrf.mxu1  ;;  %782 = vmax.xlane.f32.xlu0 %v781_v17  ;;  %v732_v19 = vpop.f32.mrf.mxu0 }
 0x472   :  { %v776_v20 = vadd.f32 %v775_v18, %v2665_v54 }
 0x473   :  { %v2247_v21 = vpop.f32.mrf.mxu0  ;;  %v2252_v22 = vpop.f32.mrf.mxu1 }
 0x474   :  { %v784_v23 = vsel %vm271_vm2, %v776_v20, -inf }
 0x475   :  { %785 = vmax.xlane.f32.xlu1 %v784_v23  ;;  %v778_v24 = vpop.f32.mrf.mxu1 }
 0x476   :  { %v2032_v24 = vld [vmem:[%s2971_s5 + $0x2] ss:$0 sm:$0xff] }
 0x477   :  { %v2253_v25 = vpop.f32.mrf.mxu1 }
 0x4fa   :  { %v783_v26 = vpop.xlane.xlu0 %782 }
 0x4fb   :  { %v787_v27 = vsub.f32 %v730_v14, %v783_v26 }
 0x4fd   :  { %v789_v28 = vmul.f32 1.442695, %v787_v27 }
 0x4fe   :  { %v786_v29 = vpop.xlane.xlu1 %785 }
 0x4ff   :  { %2425 = vpow2.f32 %v789_v28  ;;  %v788_v31 = vsub.f32 %v776_v20, %v786_v29 }
 0x501   :  { %v791_v33 = vmul.f32 1.442695, %v788_v31 }
 0x503   :  { %2427 = vpow2.f32 %v791_v33 }
 0x50c   :  { %v2426_v35 = vpop.eup %2425 }
 0x50d   :  { %v793_v36 = vsel %vm271_vm2, %v2426_v35, 0.0 }
 0x50e   :  { %794 = vadd.xlane.f32.xlu0 %v793_v36 }
 0x510   :  { %v2428_v37 = vpop.eup %2427 }
 0x511   :  { %v796_v38 = vsel %vm271_vm2, %v2428_v37, 0.0 }
 0x512   :  { %797 = vadd.xlane.f32.xlu1 %v796_v38  ;;  %v2050_v38 = vld [vmem:[%s2975_s9 + $0x2] ss:$0 sm:$0xff] }
 0x597   :  { %v795_v39 = vpop.xlane.xlu0 %794 }
 0x598   :  { %2429 = vrcp.f32 %v795_v39 }
 0x59b   :  { %v798_v40 = vpop.xlane.xlu1 %797 }
 0x59c   :  { %2431 = vrcp.f32 %v798_v40 }
 0x5a5   :  { %v2430_v41 = vpop.eup %2429 }
 0x5a6   :  { %v801_v42 = vmul.f32 %v2430_v41, %v2426_v35 }
 0x5a8   :  { %v803_v43 = vpack.c.bf16 %v801_v42, %v801_v42  ;;  %1927 = vst.msk [vmem:[#allocation4 + $0x8] sm:$0xff] %vm271_vm2, %v801_v42 }
 0x5a9   :  { %v2432_v44 = vpop.eup %2431 }
 0x5aa   :  { %2257 = vmatmul.mubr.msk.bf16.vlgmr.msra.gmra.mxu0 %vm271_vm2, %v803_v43  ;;  %v802_v46 = vmul.f32 %v2432_v44, %v2428_v37 }
 0x5ab   :  { %2268 = vmatprep.mubr.msk.bf16.mxu0 %vm2494_vm0, %v2493_v1  ;;  %2267 = vmatpush3.bf16.msra.mxu0 %v904_v52 }
 0x5ac   :  { %v804_v47 = vpack.c.bf16 %v802_v46, %v802_v46  ;;  %1931 = vst.msk [vmem:[#allocation4 + $0x28] sm:$0xff] %vm271_vm2, %v802_v46  ;;  %2278 = vmatprep.subr.bf16.mxu0 %v2493_v1 }
 0x5ae   :  { %2263 = vmatmul.mubr.msk.bf16.vlgmr.msra.gmra.mxu1 %vm271_vm2, %v804_v47 }
 0x5af   :  { %2273 = vmatpush3.bf16.msra.mxu1 %v951_v48  ;;  %2274 = vmatprep.mubr.msk.bf16.mxu1 %vm2494_vm0, %v2493_v1 }
 0x5b0   :  { %2286 = vmatprep.subr.bf16.mxu1 %v2493_v1 }
 0x5b6   :  { %2275 = vmatmul.mubr.msk.bf16.vlgmr.msra.gmra.mxu1 %vm271_vm2, %v481_v34 }
 0x5b7   :  { %2287 = vmatpush3.bf16.msra.mxu1 %v2405_v49  ;;  %2290 = vmatprep.mubr.msk.bf16.mxu1 %vm2494_vm0, %v2493_v1 }
 0x5b8   :  { %2288 = vmatprep.subr.bf16.mxu1 %v2493_v1 }
 0x5bb   :  { %2289 = vmatpush3.bf16.msra.mxu1 %v2406_v50 }
 0x5bc   :  { %2302 = vmatprep.subr.bf16.mxu1 %v2493_v1 }
 0x5be   :  { %2291 = vmatmul.mubr.msk.bf16.vlgmr.msra.gmra.mxu1 %vm84_vm1, %v2604_v10 }
 0x5bf   :  { %2304 = vmatprep.mubr.msk.bf16.mxu1 %vm2494_vm0, %v2493_v1 }
 0x66a   :  { %v845_v30 = vpop.f32.mrf.mxu0 }
 0x66c   :  { %v2258_v32 = vpop.f32.mrf.mxu0 }
 0x66e   :  { %v848_v34 = vpop.f32.mrf.mxu0  ;;  %v891_v53 = vpop.f32.mrf.mxu1 }
 0x66f   :  { %v897_v57 = vpack.c.bf16 %v891_v53, %v845_v30 }
 0x670   :  { %v2259_v58 = vpop.f32.mrf.mxu0  ;;  %v2264_v59 = vpop.f32.mrf.mxu1 }
 0x671   :  { %2269 = vmatmul.mubr.msk.bf16.vlgmr.msra.gmra.mxu0 %vm271_vm2, %v897_v57 }
 0x672   :  { %v894_v60 = vpop.f32.mrf.mxu1  ;;  %2279 = vmatpush3.bf16.msra.mxu0 %v2407_v56  ;;  %2282 = vmatprep.mubr.msk.bf16.mxu0 %vm2494_vm0, %v2493_v1 }
 0x673   :  { %2280 = vmatprep.subr.bf16.mxu0 %v2493_v1 }
 0x674   :  { %v2265_v62 = vpop.f32.mrf.mxu1 }
 0x676   :  { %v2800_v63 = vpop.f32.mrf.mxu1  ;;  %2281 = vmatpush3.bf16.msra.mxu0 %v2408_v61 }
 0x677   :  { %2294 = vmatprep.subr.bf16.mxu0 %v2493_v1 }
 0x678   :  { %v2276_v2 = vpop.f32.mrf.mxu1 }
 0x679   :  { %2283 = vmatmul.mubr.msk.bf16.vlgmr.msra.gmra.mxu0 %vm84_vm1, %v2599_v8 }
 0x67a   :  { %v2808_v3 = vpop.f32.mrf.mxu1  ;;  %2295 = vmatpush3.bf16.msra.mxu0 %v2409_v0  ;;  %2298 = vmatprep.mubr.msk.bf16.mxu0 %vm2494_vm0, %v2493_v1 }
 0x67b   :  { %2296 = vmatprep.subr.bf16.mxu0 %v2493_v1 }
 0x67c   :  { %v2277_v4 = vpop.f32.mrf.mxu1 }
 0x67e   :  { %v1121_v6 = vpop.f32.mrf.mxu1  ;;  %2297 = vmatpush3.bf16.msra.mxu0 %v2410_v13 }
 0x67f   :  { %v1122_v7 = vadd.f32 %v2041_v5, %v1121_v6  ;;  %2308 = vmatprep.subr.bf16.mxu0 %v2493_v1 }
 0x680   :  { %v2292_v9 = vpop.f32.mrf.mxu1 }
 0x681   :  { %v1196_v11 = vpack.c.bf16 %v1122_v7, %v1122_v7  ;;  %2299 = vmatmul.mubr.msk.bf16.vlgmr.msra.gmra.mxu0 %vm84_vm1, %v2629_v15 }
 0x682   :  { %v1124_v12 = vpop.f32.mrf.mxu1  ;;  %2310 = vmatprep.mubr.msk.bf16.mxu0 %vm2494_vm0, %v2493_v1 }
 0x683   :  { %v1204_v14 = vsel %vm271_vm2, %v1196_v11, 0  ;;  %v1125_v16 = vadd.f32 %v2041_v5, %v1124_v12 }
 0x684   :  { %v2293_v17 = vpop.f32.mrf.mxu1  ;;  %2303 = vmatpush3.bf16.xpose.msra.mxu1 %v1204_v14 }
 0x685   :  { %v1197_v18 = vpack.c.bf16 %v1125_v16, %v1125_v16  ;;  %2314 = vmatprep.subr.bf16.mxu1 %v2493_v1 }
 0x687   :  { %v1250_v19 = vsel %vm271_vm2, %v1197_v18, 0 }
 0x688   :  { %2309 = vmatpush3.bf16.xpose.msra.mxu0 %v1250_v19 }
 0x689   :  { %2320 = vmatprep.subr.bf16.mxu0 %v2493_v1 }
 0x731   :  { %v2828_v20 = vpop.f32.mrf.mxu0 }
 0x733   :  { %v2270_v21 = vpop.f32.mrf.mxu0 }
 0x734   :  { %v2058_v21 = vld [vmem:[%s2976_s10 + $0x8] sm:$0xf] }
 0x735   :  { %v2830_v22 = vpop.f32.mrf.mxu0 }
 0x737   :  { %v2271_v23 = vpop.f32.mrf.mxu0 }
 0x738   :  { %v1415_v23 = vsel %vm391_vm3, %v2058_v21, 0 }
 0x739   :  { %v1053_v25 = vpop.f32.mrf.mxu0 }
 0x73a   :  { %v1054_v26 = vadd.f32 %v2032_v24, %v1053_v25  ;;  %v2414_v25 = vld [vmem:[%s2970_s4 + $0x30] sm:$0xff]  }
 0x73b   :  { %v2284_v27 = vpop.f32.mrf.mxu0 }
 0x73c   :  { %v1060_v28 = vmul.f32 0.35355338, %v1054_v26 }
 0x73d   :  { %v1056_v29 = vpop.f32.mrf.mxu0 }
 0x73e   :  { %v1194_v31 = vpack.c.bf16 %v1060_v28, %v1060_v28  ;;  %v1057_v33 = vadd.f32 %v2032_v24, %v1056_v29  ;;  %v2412_v24 = vld [vmem:[%s2970_s4 + $0x38] sm:$0xff]  }
 0x73f   :  { %v2285_v35 = vpop.f32.mrf.mxu0 }
 0x740   :  { %v1061_v36 = vmul.f32 0.35355338, %v1057_v33  ;;  %2305 = vmatmul.mubr.msk.bf16.vlgmr.msra.gmra.mxu1 %vm271_vm2, %v1194_v31  ;;  %v2411_v31 = vld [vmem:[%s2972_s6 + $0x38] sm:$0xff]  }
 0x741   :  { %2316 = vmatprep.mubr.msk.bf16.mxu1 %vm2494_vm0, %v2493_v1  ;;  %v1187_v39 = vpop.f32.mrf.mxu0 }
 0x742   :  { %v1195_v37 = vpack.c.bf16 %v1061_v36, %v1061_v36  ;;  %v1188_v40 = vadd.f32 %v2050_v38, %v1187_v39  ;;  %v2415_v39 = vld [vmem:[%s2974_s8 + $0x38] sm:$0xff]  }
 0x743   :  { %v2300_v41 = vpop.f32.mrf.mxu0 }
 0x744   :  { %2311 = vmatmul.mubr.msk.bf16.vlgmr.msra.gmra.mxu0 %vm271_vm2, %v1195_v37  ;;  %v1198_v42 = vpack.c.bf16 %v1188_v40, %v1188_v40  ;;  %v2416_v40 = vld [vmem:[%s2974_s8 + $0x30] sm:$0xff]  }
 0x745   :  { %2322 = vmatprep.mubr.msk.bf16.mxu0 %vm2494_vm0, %v2493_v1  ;;  %v1190_v43 = vpop.f32.mrf.mxu0 }
 0x746   :  { %v1320_v44 = vsel %vm391_vm3, %v1198_v42, 0  ;;  %v1191_v45 = vadd.f32 %v2050_v38, %v1190_v43 }
 0x747   :  { %v2301_v46 = vpop.f32.mrf.mxu0  ;;  %2315 = vmatpush3.bf16.msra.mxu1 %v1320_v44  ;;  %v988_v44 = vadd.f32 %v2800_v63, %v2828_v20 }
 0x748   :  { %v1199_v47 = vpack.c.bf16 %v1191_v45, %v1191_v45  ;;  %2326 = vmatprep.subr.bf16.mxu1 %v2493_v1 }
 0x74a   :  { %v1366_v48 = vsel %vm391_vm3, %v1199_v47, 0 }
 0x74b   :  { %2321 = vmatpush3.bf16.msra.mxu0 %v1366_v48  ;;  %v991_v48 = vadd.f32 %v2808_v3, %v2830_v22 }
 0x74c   :  { %2332 = vmatprep.subr.bf16.mxu0 %v2493_v1 }
 0x800   :  { %v1240_v49 = vpop.f32.mrf.mxu1 }
 0x801   :  { %v1241_v50 = vadd.f32 %v1240_v49, %v2667_v55 }
 0x802   :  { %v2306_v51 = vpop.f32.mrf.mxu1 }
 0x803   :  { %v1292_v52 = vsel %vm271_vm2, %v1241_v50, -inf }
 0x804   :  { %1293 = vmax.xlane.f32.xlu0 %v1292_v52  ;;  %v1243_v30 = vpop.f32.mrf.mxu1  ;;  %v1286_v32 = vpop.f32.mrf.mxu0  ;;  %v2065_v52 = vld [vmem:[%s2971_s5 + $0x3] ss:$0 sm:$0xff] }
 0x805   :  { %v1287_v34 = vadd.f32 %v1286_v32, %v2665_v54 }
 0x806   :  { %v2307_v53 = vpop.f32.mrf.mxu1  ;;  %v2312_v56 = vpop.f32.mrf.mxu0 }
 0x807   :  { %v1295_v57 = vsel %vm271_vm2, %v1287_v34, -inf }
 0x808   :  { %1296 = vmax.xlane.f32.xlu1 %v1295_v57  ;;  %v1289_v58 = vpop.f32.mrf.mxu0 }
 0x80a   :  { %v2313_v59 = vpop.f32.mrf.mxu0 }
 0x88d   :  { %v1294_v60 = vpop.xlane.xlu0 %1293 }
 0x88e   :  { %v1298_v61 = vsub.f32 %v1241_v50, %v1294_v60 }
 0x890   :  { %v1300_v62 = vmul.f32 1.442695, %v1298_v61 }
 0x891   :  { %v1297_v0 = vpop.xlane.xlu1 %1296 }
 0x892   :  { %2433 = vpow2.f32 %v1300_v62  ;;  %v1299_v2 = vsub.f32 %v1287_v34, %v1297_v0 }
 0x894   :  { %v1302_v4 = vmul.f32 1.442695, %v1299_v2  ;;  %v2083_v2 = vld [vmem:[%s2975_s9 + $0x3] ss:$0 sm:$0xff] }
 0x896   :  { %2435 = vpow2.f32 %v1302_v4 }
 0x89f   :  { %v2434_v5 = vpop.eup %2433 }
 0x8a0   :  { %v1304_v6 = vsel %vm271_vm2, %v2434_v5, 0.0 }
 0x8a1   :  { %1305 = vadd.xlane.f32.xlu0 %v1304_v6 }
 0x8a3   :  { %v2436_v7 = vpop.eup %2435 }
 0x8a4   :  { %v1307_v9 = vsel %vm271_vm2, %v2436_v7, 0.0 }
 0x8a5   :  { %1308 = vadd.xlane.f32.xlu1 %v1307_v9 }
 0x92a   :  { %v1306_v11 = vpop.xlane.xlu0 %1305 }
 0x92b   :  { %2437 = vrcp.f32 %v1306_v11 }
 0x92e   :  { %v1309_v12 = vpop.xlane.xlu1 %1308 }
 0x92f   :  { %2439 = vrcp.f32 %v1309_v12 }
 0x938   :  { %v2438_v13 = vpop.eup %2437 }
 0x939   :  { %v1312_v14 = vmul.f32 %v2438_v13, %v2434_v5 }
 0x93b   :  { %v1314_v16 = vpack.c.bf16 %v1312_v14, %v1312_v14  ;;  %1928 = vst.msk [vmem:[#allocation4 + $0x10] sm:$0xff] %vm271_vm2, %v1312_v14 }
 0x93c   :  { %v2440_v17 = vpop.eup %2439 }
 0x93d   :  { %2317 = vmatmul.mubr.msk.bf16.vlgmr.msra.gmra.mxu1 %vm271_vm2, %v1314_v16  ;;  %v1313_v18 = vmul.f32 %v2440_v17, %v2436_v7 }
 0x93e   :  { %2328 = vmatprep.mubr.msk.bf16.mxu1 %vm2494_vm0, %v2493_v1  ;;  %2327 = vmatpush3.bf16.msra.mxu1 %v1415_v23 }
 0x93f   :  { %v1315_v19 = vpack.c.bf16 %v1313_v18, %v1313_v18  ;;  %1932 = vst.msk [vmem:[#allocation4 + $0x30] sm:$0xff] %vm271_vm2, %v1313_v18  ;;  %2340 = vmatprep.subr.bf16.mxu1 %v2493_v1 }
 0x941   :  { %2323 = vmatmul.mubr.msk.bf16.vlgmr.msra.gmra.mxu0 %vm271_vm2, %v1315_v19 }
 0x942   :  { %2336 = vmatprep.mubr.msk.bf16.mxu0 %vm2494_vm0, %v2493_v1  ;;  %2333 = vmatpush3.bf16.msra.mxu0 %v2412_v24 }
 0x943   :  { %2334 = vmatprep.subr.bf16.mxu0 %v2493_v1 }
 0x946   :  { %2335 = vmatpush3.bf16.msra.mxu0 %v2414_v25 }
 0x947   :  { %2348 = vmatprep.subr.bf16.mxu0 %v2493_v1 }
 0x949   :  { %2337 = vmatmul.mubr.msk.bf16.vlgmr.msra.gmra.mxu0 %vm84_vm1, %v2599_v8  ;;  %v2413_v8 = vld [vmem:[%s2972_s6 + $0x30] sm:$0xff]  }
 0x94a   :  { %2352 = vmatprep.mubr.msk.bf16.mxu0 %vm2494_vm0, %v2493_v1  ;;  %2349 = vmatpush3.bf16.msra.mxu0 %v2415_v39 }
 0x94b   :  { %2350 = vmatprep.subr.bf16.mxu0 %v2493_v1 }
 0x94e   :  { %2351 = vmatpush3.bf16.msra.mxu0 %v2416_v40 }
 0x94f   :  { %2362 = vmatprep.subr.bf16.mxu0 %v2493_v1 }
 0x951   :  { %2353 = vmatmul.mubr.msk.bf16.vlgmr.msra.gmra.mxu0 %vm84_vm1, %v2629_v15  ;;  %v2074_v15 = vld [vmem:[%s2973_s7 + $0x3] ss:$0 sm:$0xff] }
 0x952   :  { %2364 = vmatprep.mubr.msk.bf16.mxu0 %vm2494_vm0, %v2493_v1 }
 0x9fd   :  { %v1356_v26 = vpop.f32.mrf.mxu1 }
 0x9ff   :  { %v2318_v27 = vpop.f32.mrf.mxu1 }
 0xa01   :  { %v1359_v28 = vpop.f32.mrf.mxu1  ;;  %v1402_v29 = vpop.f32.mrf.mxu0 }
 0xa02   :  { %v1408_v33 = vpack.c.bf16 %v1402_v29, %v1356_v26 }
 0xa03   :  { %v2319_v35 = vpop.f32.mrf.mxu1  ;;  %v2324_v36 = vpop.f32.mrf.mxu0 }
 0xa04   :  { %2329 = vmatmul.mubr.msk.bf16.vlgmr.msra.gmra.mxu1 %vm271_vm2, %v1408_v33 }
 0xa05   :  { %v1405_v37 = vpop.f32.mrf.mxu0  ;;  %2341 = vmatpush3.bf16.msra.mxu1 %v2411_v31  ;;  %2344 = vmatprep.mubr.msk.bf16.mxu1 %vm2494_vm0, %v2493_v1 }
 0xa06   :  { %2342 = vmatprep.subr.bf16.mxu1 %v2493_v1 }
 0xa07   :  { %v2325_v38 = vpop.f32.mrf.mxu0 }
 0xa09   :  { %2343 = vmatpush3.bf16.msra.mxu1 %v2413_v8  ;;  %v1519_v41 = vpop.f32.mrf.mxu0 }
 0xa0a   :  { %2356 = vmatprep.subr.bf16.mxu1 %v2493_v1  ;;  %v1520_v30 = vadd.f32 %v2065_v52, %v1519_v41 }
 0xa0b   :  { %v2338_v42 = vpop.f32.mrf.mxu0 }
 0xa0c   :  { %2345 = vmatmul.mubr.msk.bf16.vlgmr.msra.gmra.mxu1 %vm84_vm1, %v2604_v10  ;;  %v1526_v22 = vmul.f32 0.35355338, %v1520_v30 }
 0xa0d   :  { %2358 = vmatprep.mubr.msk.bf16.mxu1 %vm2494_vm0, %v2493_v1  ;;  %v1522_v10 = vpop.f32.mrf.mxu0 }
 0xa0e   :  { %v1523_v59 = vadd.f32 %v2065_v52, %v1522_v10  ;;  %v1660_v60 = vpack.c.bf16 %v1526_v22, %v1526_v22 }
 0xa0f   :  { %v2339_v43 = vpop.f32.mrf.mxu0 }
 0xa10   :  { %v1527_v62 = vmul.f32 0.35355338, %v1523_v59 }
 0xa11   :  { %v1653_v4 = vpop.f32.mrf.mxu0 }
 0xa12   :  { %v1661_v0 = vpack.c.bf16 %v1527_v62, %v1527_v62  ;;  %v1654_v5 = vadd.f32 %v2083_v2, %v1653_v4 }
 0xa13   :  { %v2354_v6 = vpop.f32.mrf.mxu0 }
 0xa14   :  { %v1664_v7 = vpack.c.bf16 %v1654_v5, %v1654_v5 }
 0xa15   :  { %v1656_v9 = vpop.f32.mrf.mxu0 }
 0xa16   :  { %v1786_v11 = vsel %vm391_vm3, %v1664_v7, 0  ;;  %v1657_v12 = vadd.f32 %v2083_v2, %v1656_v9 }
 0xa17   :  { %v2355_v13 = vpop.f32.mrf.mxu0 }
 0xa18   :  { %v1665_v14 = vpack.c.bf16 %v1657_v12, %v1657_v12 }
 0xa1a   :  { %v1832_v16 = vsel %vm391_vm3, %v1665_v14, 0 }
 0xac4   :  { %v1451_v45 = vpop.f32.mrf.mxu1 }
 0xac5   :  { %v2908_v46 = vadd.f32 %v1451_v45, %v988_v44 }
 0xac6   :  { %v2330_v47 = vpop.f32.mrf.mxu1 }
 0xac8   :  { %v1454_v49 = vpop.f32.mrf.mxu1 }
 0xac9   :  { %v2912_v50 = vadd.f32 %v1454_v49, %v991_v48  ;;  %v2091_v49 = vld [vmem:[%s2976_s10 + $0xc] sm:$0xf] }
 0xaca   :  { %v2331_v51 = vpop.f32.mrf.mxu1 }
 0xacb   :  { %v1881_v51 = vsel %vm391_vm3, %v2091_v49, 0 }
 0xacc   :  { %v1587_v63 = vpop.f32.mrf.mxu1 }
 0xacd   :  { %v1588_v20 = vadd.f32 %v2074_v15, %v1587_v63 }
 0xace   :  { %v2346_v32 = vpop.f32.mrf.mxu1 }
 0xacf   :  { %v1662_v34 = vpack.c.bf16 %v1588_v20, %v1588_v20 }
 0xad0   :  { %v1590_v53 = vpop.f32.mrf.mxu1 }
 0xad1   :  { %v1670_v3 = vsel %vm271_vm2, %v1662_v34, 0  ;;  %v1591_v56 = vadd.f32 %v2074_v15, %v1590_v53 }
 0xad2   :  { %v2347_v57 = vpop.f32.mrf.mxu1  ;;  %2357 = vmatpush3.bf16.xpose.msra.mxu1 %v1670_v3 }
 0xad3   :  { %v1663_v58 = vpack.c.bf16 %v1591_v56, %v1591_v56  ;;  %2368 = vmatprep.subr.bf16.mxu1 %v2493_v1 }
 0xad5   :  { %v1716_v61 = vsel %vm271_vm2, %v1663_v58, 0 }
 0xad6   :  { %2363 = vmatpush3.bf16.xpose.msra.mxu0 %v1716_v61 }
 0xad7   :  { %2374 = vmatprep.subr.bf16.mxu0 %v2493_v1 }
 0xad9   :  { %2359 = vmatmul.mubr.msk.bf16.vlgmr.msra.gmra.mxu1 %vm271_vm2, %v1660_v60 }
 0xada   :  { %2370 = vmatprep.mubr.msk.bf16.mxu1 %vm2494_vm0, %v2493_v1  ;;  %2369 = vmatpush3.bf16.msra.mxu1 %v1786_v11 }
 0xadb   :  { %2380 = vmatprep.subr.bf16.mxu1 %v2493_v1 }
 0xadd   :  { %2365 = vmatmul.mubr.msk.bf16.vlgmr.msra.gmra.mxu0 %vm271_vm2, %v1661_v0 }
 0xade   :  { %2376 = vmatprep.mubr.msk.bf16.mxu0 %vm2494_vm0, %v2493_v1  ;;  %2375 = vmatpush3.bf16.msra.mxu0 %v1832_v16 }
 0xb99   :  { %v1706_v17 = vpop.f32.mrf.mxu1 }
 0xb9a   :  { %v1707_v18 = vadd.f32 %v1706_v17, %v2667_v55 }
 0xb9b   :  { %v2360_v19 = vpop.f32.mrf.mxu1 }
 0xb9c   :  { %v1758_v21 = vsel %vm271_vm2, %v1707_v18, -inf }
 0xb9d   :  { %1759 = vmax.xlane.f32.xlu0 %v1758_v21  ;;  %v1709_v23 = vpop.f32.mrf.mxu1  ;;  %v1752_v24 = vpop.f32.mrf.mxu0 }
 0xb9e   :  { %v1753_v25 = vadd.f32 %v1752_v24, %v2665_v54 }
 0xb9f   :  { %v2361_v26 = vpop.f32.mrf.mxu1  ;;  %v2366_v27 = vpop.f32.mrf.mxu0 }
 0xba0   :  { %v1761_v28 = vsel %vm271_vm2, %v1753_v25, -inf }
 0xba1   :  { %1762 = vmax.xlane.f32.xlu1 %v1761_v28  ;;  %v1755_v29 = vpop.f32.mrf.mxu0 }
 0xba3   :  { %v2367_v31 = vpop.f32.mrf.mxu0 }
 0xc26   :  { %v1760_v33 = vpop.xlane.xlu0 %1759 }
 0xc27   :  { %v1764_v35 = vsub.f32 %v1707_v18, %v1760_v33 }
 0xc29   :  { %v1766_v36 = vmul.f32 1.442695, %v1764_v35 }
 0xc2a   :  { %v1763_v37 = vpop.xlane.xlu1 %1762 }
 0xc2b   :  { %2441 = vpow2.f32 %v1766_v36  ;;  %v1765_v55 = vsub.f32 %v1753_v25, %v1763_v37 }
 0xc2d   :  { %v1768_v8 = vmul.f32 1.442695, %v1765_v55 }
 0xc2f   :  { %2443 = vpow2.f32 %v1768_v8 }
 0xc38   :  { %v2442_v38 = vpop.eup %2441 }
 0xc39   :  { %v1770_v39 = vsel %vm271_vm2, %v2442_v38, 0.0 }
 0xc3a   :  { %1771 = vadd.xlane.f32.xlu0 %v1770_v39 }
 0xc3c   :  { %v2444_v54 = vpop.eup %2443 }
 0xc3d   :  { %v1773_v40 = vsel %vm271_vm2, %v2444_v54, 0.0 }
 0xc3e   :  { %1774 = vadd.xlane.f32.xlu1 %v1773_v40 }
 0xcc3   :  { %v1772_v41 = vpop.xlane.xlu0 %1771 }
 0xcc4   :  { %2445 = vrcp.f32 %v1772_v41 }
 0xcc7   :  { %v1775_v42 = vpop.xlane.xlu1 %1774 }
 0xcc8   :  { %2447 = vrcp.f32 %v1775_v42 }
 0xcd1   :  { %v2446_v10 = vpop.eup %2445 }
 0xcd2   :  { %v1778_v43 = vmul.f32 %v2446_v10, %v2442_v38 }
 0xcd4   :  { %1929 = vst.msk [vmem:[#allocation4 + $0x18] sm:$0xff] %vm271_vm2, %v1778_v43  ;;  %v1780_v44 = vpack.c.bf16 %v1778_v43, %v1778_v43 }
 0xcd5   :  { %v2448_v45 = vpop.eup %2447 }
 0xcd6   :  { %v1779_v47 = vmul.f32 %v2448_v45, %v2444_v54  ;;  %2371 = vmatmul.mubr.msk.bf16.vlgmr.msra.gmra.mxu1 %vm271_vm2, %v1780_v44 }
 0xcd7   :  { %2382 = vmatprep.mubr.msk.bf16.mxu1 %vm2494_vm0, %v2493_v1  ;;  %2381 = vmatpush3.bf16.msra.mxu1 %v1881_v51 }
 0xcd8   :  { %1933 = vst.msk [vmem:[#allocation4 + $0x38] sm:$0xff] %vm271_vm2, %v1779_v47  ;;  %v1781_v48 = vpack.c.bf16 %v1779_v47, %v1779_v47 }
 0xcda   :  { %2377 = vmatmul.mubr.msk.bf16.vlgmr.msra.gmra.mxu0 %vm271_vm2, %v1781_v48 }
 0xd96   :  { %v1822_v15 = vpop.f32.mrf.mxu1 }
 0xd98   :  { %v2372_v52 = vpop.f32.mrf.mxu1 }
 0xd9a   :  { %v1825_v63 = vpop.f32.mrf.mxu1  ;;  %v1868_v20 = vpop.f32.mrf.mxu0 }
 0xd9b   :  { %v1874_v30 = vpack.c.bf16 %v1868_v20, %v1822_v15 }
 0xd9c   :  { %v2373_v32 = vpop.f32.mrf.mxu1  ;;  %v2378_v34 = vpop.f32.mrf.mxu0 }
 0xd9d   :  { %2383 = vmatmul.mubr.msk.bf16.vlgmr.msra.gmra.mxu1 %vm271_vm2, %v1874_v30 }
 0xd9e   :  { %v1871_v1 = vpop.f32.mrf.mxu0 }
 0xda0   :  { %v2379_v53 = vpop.f32.mrf.mxu0 }
 0xda1   :  { %2460 = shalt.err (!%p2457_p4)
}
 0xda2   :  { %s2497_s10 = smov 128   ;;  %s2498_s18 = smov 8   ;;  %v2093_v22 = vld [vmem:[%s2977_s11] ss:$0 sm:$0xff] }
 0xda3   :  { %1968 = dma.vmem_to_hbm [thread:$0]  %s1963_s2, 1024, %s2979_s13, [#allocation5], %s2497_s10, %s2497_s10, %s2498_s18  }
 0xda4   :  { %s2499_s22 = smov [#allocation2]  }
 0xda5   :  { %s1950_s23 = sshll.u32 %s2499_s22, 4  ;;  %s1951_s23 = int_to_ptr.vmem [resolvable:$true] %s1950_s23 }
 0xda6   :  { %s2469_s13 = scalar_lea.vmem %s1951_s23, 256  ;;  %p2474_p6 = scmp.lt.s32.totalorder %s1951_s23, %s1951_s23 }
 0xda7   :  { %p2470_p5 = scmp.ne.s32.totalorder %s1951_s23, %s2469_s13  ;;  %p2475_p7 = scmp.lt.s32.totalorder %s2469_s13, %s2469_s13 }
 0xda9   :  { %p2476_p8 = por %p2475_p7, %p2474_p6 }
 0xdab   :  { %p2477_p9 = pnand %p2476_p8, %p2470_p5 }
 0xe5d   :  { %v1917_v3 = vpop.f32.mrf.mxu1 }
 0xe5e   :  { %v1924_v56 = vadd.f32 %v1917_v3, %v2908_v46 }
 0xe5f   :  { %v2384_v57 = vpop.f32.mrf.mxu1 }
 0xe60   :  { %v1941_v58 = vadd.f32 %v2093_v22, %v1924_v56 }
 0xe61   :  { %v1920_v59 = vpop.f32.mrf.mxu1 }
 0xe62   :  { %1943 = vst.msk [vmem:[#allocation2] sm:$0xff] %vm84_vm1, %v1941_v58  ;;  %v1925_v60 = vadd.f32 %v1920_v59, %v2912_v50 }
 0xe63   :  { %v2385_v61 = vpop.f32.mrf.mxu1 }
 0xe64   :  { %v1942_v62 = vadd.f32 %v2093_v22, %v1925_v60 }
 0xe66   :  { %1944 = vst.msk [vmem:[#allocation2 + $0x8] sm:$0xff] %vm84_vm1, %v1942_v62 }
 0xe67   :  { %2480 = shalt.err (!%p2477_p9)
}
 0xe68   :  { %1956 = dma.vmem_to_hbm [thread:$0]  %s1951_s23, 256, %s2978_s12, [#allocation3], %s2497_s10, %s2497_s10, %s2498_s18  }
 0xe69   :  { %2489 = dma.done.wait [#allocation3], 256  }
 0xe6a   :  { %2490 = vsyncadd [#allocation3], 4294967040 }
 0xe6b   :  { %2491 = dma.done.wait [#allocation5], 1024  }
 0xe6c   :  { %2492 = vsyncadd [#allocation5], 4294966272 }
 0xe6d   :  { %1975 = vsyncpa [#allocation3], 1 }
 0xe6e   :  { %1976 = vsyncpa [#allocation5], 1 }

</bundles_post_ra>
